<compile_context>
chip_gen: v6e
topology: v6e:2x2x1
jax: 0.10.0
libtpu: 0.0.40
codegen_flags: <defaults>
</compile_context>

<pallas_src>
import functools

import jax
import jax.numpy as jnp
from jax.experimental import pallas as pl
from jax.experimental.pallas import tpu as pltpu

NUM_CLASSES = 11     # data='MUSIC'
FEAT_DIM = 512       # v_l='level4'
CLS_PAD = 128        # lane-dense padded class dimension (multiple of 128)
DROP_P = 0.8


def _round_up(n, m):
    return ((n + m - 1) // m) * m


def _av_kernel(*refs, training):
    if training:
        x_ref, wv_ref, bv_ref, wc_ref, bc_ref, m_ref, out_ref, acc_ref = refs
    else:
        x_ref, wv_ref, bv_ref, wc_ref, bc_ref, out_ref, acc_ref = refs
        m_ref = None

    k = pl.program_id(1)

    @pl.when(k == 0)
    def _init():
        acc_ref[...] = jnp.zeros_like(acc_ref)

    # Visual feature extractor (stand-in Linear), K-tiled with f32 accumulation.
    acc_ref[...] += jnp.dot(x_ref[...].astype(jnp.bfloat16), wv_ref[...],
                            preferred_element_type=jnp.float32)

    @pl.when(k == pl.num_programs(1) - 1)
    def _finalize():
        # bias + relu
        feat = jnp.maximum(acc_ref[...] + bv_ref[...], 0.0)
        if training:
            # dropout keep-mask (0/1); the 1/(1-p) rescale is folded into wc.
            feat = feat * m_ref[...].astype(jnp.float32)
        # class_layer into a lane-dense 128-wide block
        logits = jnp.dot(feat.astype(jnp.bfloat16), wc_ref[...],
                         preferred_element_type=jnp.float32) + bc_ref[...]
        col = jax.lax.broadcasted_iota(jnp.int32, logits.shape, 1)
        logits = jnp.where(col < NUM_CLASSES, logits, -1e30)   # mask padded classes
        # log_softmax(dim=1)
        mx = jnp.max(logits, axis=1, keepdims=True)
        shifted = logits - mx
        lse = jnp.log(jnp.sum(jnp.exp(shifted), axis=1, keepdims=True))
        out_ref[...] = shifted - lse


def prepare_params(params, d_in, training):
    """One-time weight preprocessing (pad / scale / cast). Call once, not per forward."""
    wv, bv, wc, bc = params
    d_pad = _round_up(d_in, 256)                           # fill whole MXU K passes
    wv_p = wv if d_pad == d_in else jnp.pad(wv, ((0, d_pad - d_in), (0, 0)))
    wc_p = jnp.zeros((FEAT_DIM, CLS_PAD), jnp.float32).at[:, :NUM_CLASSES].set(
        wc.reshape(FEAT_DIM, NUM_CLASSES))
    if training:
        wc_p = wc_p * (1.0 / (1.0 - DROP_P))               # fold dropout rescale
    bc_p = jnp.zeros((1, CLS_PAD), jnp.float32).at[:, :NUM_CLASSES].set(
        bc.reshape(1, NUM_CLASSES))
    return (wv_p.astype(jnp.bfloat16),
            bv.reshape(1, FEAT_DIM).astype(jnp.float32),
            wc_p.astype(jnp.bfloat16),
            bc_p)


def av_model_forward(x_nchw, prepared, *, training, keep_mask=None, rng=None):
    """Fused AV_Model forward. x_nchw: (B, C, H, W) float32."""
    wv_bf, bv_f, wc_bf, bc_f = prepared
    d_pad = wv_bf.shape[0]

    B = x_nchw.shape[0]
    x_flat = x_nchw.reshape(B, -1).astype(jnp.float32)
    d_in = x_flat.shape[1]
    if d_in != d_pad:                                       # zero-pad K (rare; wv padded too)
        x_flat = jnp.pad(x_flat, ((0, 0), (0, d_pad - d_in)))

    if training:
        if keep_mask is None:
            keep_mask = jax.random.uniform(rng, (B, FEAT_DIM)) >= DROP_P
        keep_mask = keep_mask.astype(jnp.bfloat16)          # compact {0,1} mask

    # Batch tile: multiple of 16, up to 512; split into >=2 tiles when possible so the
    # 'parallel' batch axis can shard across both v7x TensorCores.
    b16 = _round_up(B, 16)
    tb = min(512, b16)
    if b16 // tb < 2 and b16 >= 32:
        tb = _round_up(b16 // 2, 16)
    nb = pl.cdiv(B, tb)

    # K tile: exact divisor of the 256-padded feature-in dim (no garbage accumulation).
    if d_pad <= 2048:
        tk = d_pad
    elif d_pad % 512 == 0:
        tk = 512
    else:
        tk = 256
    nk = d_pad // tk

    in_specs = [
        pl.BlockSpec((tb, tk), lambda i, k: (i, k)),             # x tile (pipelined)
        pl.BlockSpec((tk, FEAT_DIM), lambda i, k: (k, 0)),       # W_visual (K-tiled)
        pl.BlockSpec((1, FEAT_DIM), lambda i, k: (0, 0)),        # b_visual
        pl.BlockSpec((FEAT_DIM, CLS_PAD), lambda i, k: (0, 0)),  # W_class (resident)
        pl.BlockSpec((1, CLS_PAD), lambda i, k: (0, 0)),         # b_class
    ]
    args = [x_flat, wv_bf, bv_f, wc_bf, bc_f]
    if training:
        in_specs.append(pl.BlockSpec((tb, FEAT_DIM), lambda i, k: (i, 0)))  # keep-mask
        args.append(keep_mask)

    flops = 2 * B * d_pad * FEAT_DIM + 2 * B * FEAT_DIM * CLS_PAD
    bytes_accessed = (x_flat.size * 4 + wv_bf.size * 2 + wc_bf.size * 2
                      + bv_f.size * 4 + bc_f.size * 4 + B * CLS_PAD * 4
                      + (B * FEAT_DIM * 2 if training else 0))
    cost = pl.CostEstimate(flops=flops, transcendentals=B * CLS_PAD,
                           bytes_accessed=bytes_accessed)

    out = pl.pallas_call(
        functools.partial(_av_kernel, training=training),
        out_shape=jax.ShapeDtypeStruct((B, CLS_PAD), jnp.float32),
        grid=(nb, nk),
        in_specs=in_specs,
        out_specs=pl.BlockSpec((tb, CLS_PAD), lambda i, k: (i, 0)),
        scratch_shapes=[pltpu.VMEM((tb, FEAT_DIM), jnp.float32)],
        compiler_params=pltpu.CompilerParams(
            dimension_semantics=("parallel", "arbitrary"),
            vmem_limit_bytes=48 * 1024 * 1024),
        cost_estimate=cost,
    )(*args)

    return out[:, :NUM_CLASSES]


if __name__ == "__main__":
    key = jax.random.PRNGKey(0)
    k1, k2, k3, k4, k5, k6 = jax.random.split(key, 6)
    B, C, H, W = 2, 4, 16, 16
    D_in = C * H * W                     # 1024

    x = jax.random.normal(k1, (B, C, H, W), dtype=jnp.float32)

    # TODO(synk): `visual_net` is an external constructor argument with no definition in
    # the module; stand-in is a single Linear(C*H*W -> 512) producing level4 features.
    lim_v = 1.0 / (D_in ** 0.5)
    wv = jax.random.uniform(k2, (D_in, FEAT_DIM), minval=-lim_v, maxval=lim_v,
                            dtype=jnp.float32)
    bv = jax.random.uniform(k3, (1, FEAT_DIM), minval=-lim_v, maxval=lim_v,
                            dtype=jnp.float32)
    lim_c = 1.0 / (FEAT_DIM ** 0.5)
    wc = jax.random.uniform(k4, (FEAT_DIM, NUM_CLASSES), minval=-lim_c, maxval=lim_c,
                            dtype=jnp.float32)
    bc = jax.random.uniform(k5, (1, NUM_CLASSES), minval=-lim_c, maxval=lim_c,
                            dtype=jnp.float32)
    params = (wv, bv, wc, bc)

    # ---- eval mode (dropout == identity) vs bf16-matched reference ----
    prep_eval = prepare_params(params, D_in, training=False)
    out_eval = av_model_forward(x, prep_eval, training=False)
    jax.block_until_ready(out_eval)

    x_bf = x.reshape(B, -1).astype(jnp.bfloat16)
    feat_ref = jnp.maximum(
        jnp.dot(x_bf, wv.astype(jnp.bfloat16), preferred_element_type=jnp.float32) + bv, 0.0)
    logits_ref = jnp.dot(feat_ref.astype(jnp.bfloat16), wc.astype(jnp.bfloat16),
                         preferred_element_type=jnp.float32) + bc
    ref_eval = jax.nn.log_softmax(logits_ref, axis=1)
    assert out_eval.shape == (B, NUM_CLASSES)
    assert jnp.allclose(out_eval, ref_eval, atol=2e-2), "eval-mode mismatch vs reference"

    # ---- training mode (dropout active; explicit keep-mask for a deterministic check) ----
    prep_train = prepare_params(params, D_in, training=True)
    keep = (jax.random.uniform(k6, (B, FEAT_DIM)) >= DROP_P).astype(jnp.bfloat16)
    out_train = av_model_forward(x, prep_train, training=True, keep_mask=keep)
    jax.block_until_ready(out_train)

    wv_t, bv_t, wc_t, bc_t = prep_train
    feat_t = jnp.maximum(
        jnp.dot(x_bf, wv_t[:D_in], preferred_element_type=jnp.float32) + bv_t, 0.0)
    feat_t = feat_t * keep.astype(jnp.float32)
    logits_t = jnp.dot(feat_t.astype(jnp.bfloat16), wc_t[:, :NUM_CLASSES],
                       preferred_element_type=jnp.float32) + bc_t[:, :NUM_CLASSES]
    ref_train = jax.nn.log_softmax(logits_t, axis=1)
    assert out_train.shape == (B, NUM_CLASSES)
    assert bool(jnp.all(jnp.isfinite(out_train)))
    assert jnp.allclose(out_train, ref_train, atol=2e-2), "train-mode mismatch vs reference"

    print("KERNEL_OK")
</pallas_src>

<mosaic_0001>
module attributes {stable_mosaic.version = 11 : i64} {
  func.func @_av_kernel(%arg0: i32, %arg1: i32, %arg2: memref<16x1024xf32, #tpu.memory_space<vmem>>, %arg3: memref<1024x512xbf16, #tpu.memory_space<vmem>>, %arg4: memref<1x512xf32, #tpu.memory_space<vmem>>, %arg5: memref<512x128xbf16, #tpu.memory_space<vmem>>, %arg6: memref<1x128xf32, #tpu.memory_space<vmem>>, %arg7: memref<16x128xf32, #tpu.memory_space<vmem>>, %arg8: memref<16x512xf32, #tpu.memory_space<vmem>>) attributes {dimension_semantics = [#tpu.dimension_semantics<parallel>, #tpu.dimension_semantics<arbitrary>], iteration_bounds = array<i64: 1, 1>, scalar_prefetch = 0 : i64, scratch_operands = 1 : i64, tpu.core_type = #tpu.core_type<tc>, window_params = [{transform_indices = @transform_0, window_bounds = array<i64: 16, 1024>}, {transform_indices = @transform_1, window_bounds = array<i64: 1024, 512>}, {pipeline_mode = #tpu.pipeline_mode<synchronous>, transform_indices = @transform_2, window_bounds = array<i64: 1, 512>}, {pipeline_mode = #tpu.pipeline_mode<synchronous>, transform_indices = @transform_3, window_bounds = array<i64: 512, 128>}, {pipeline_mode = #tpu.pipeline_mode<synchronous>, transform_indices = @transform_4, window_bounds = array<i64: 1, 128>}, {transform_indices = @transform_5, window_bounds = array<i64: 16, 128>}]} {
    %c0_i32 = arith.constant 0 : i32
    %0 = arith.cmpi eq, %arg1, %c0_i32 : i32
    %1 = arith.extui %0 : i1 to i32
    %c0_i32_0 = arith.constant 0 : i32
    %2 = arith.cmpi ne, %1, %c0_i32_0 : i32
    scf.if %2 {
      %cst_10 = arith.constant 0.000000e+00 : f32
      %13 = vector.broadcast %cst_10 : f32 to vector<16x512xf32>
      %c0_11 = arith.constant 0 : index
      %c0_12 = arith.constant 0 : index
      %14 = vector.load %arg8[%c0_11, %c0_12] : memref<16x512xf32, #tpu.memory_space<vmem>>, vector<16x512xf32>
      tpu.vector_store %arg8[%c0_11, %c0_12], %13 {strides = array<i32>} : memref<16x512xf32, #tpu.memory_space<vmem>>, vector<16x512xf32>,
    } else {
    }
    %c0 = arith.constant 0 : index
    %c0_1 = arith.constant 0 : index
    %3 = vector.load %arg8[%c0, %c0_1] : memref<16x512xf32, #tpu.memory_space<vmem>>, vector<16x512xf32>
    %c0_2 = arith.constant 0 : index
    %c0_3 = arith.constant 0 : index
    %4 = vector.load %arg2[%c0_2, %c0_3] : memref<16x1024xf32, #tpu.memory_space<vmem>>, vector<16x1024xf32>
    %5 = arith.truncf %4 : vector<16x1024xf32> to vector<16x1024xbf16>
    %c0_4 = arith.constant 0 : index
    %c0_5 = arith.constant 0 : index
    %6 = vector.load %arg3[%c0_4, %c0_5] : memref<1024x512xbf16, #tpu.memory_space<vmem>>, vector<1024x512xbf16>
    %cst = arith.constant dense<0.000000e+00> : vector<16x512xf32>
    %7 = tpu.matmul %5, %6, %cst {dimension_numbers = #tpu.dot_dimension_numbers<[1], [0], [0], [1], [0, 0, 1, 1], [], []>} : vector<16x1024xbf16>, vector<1024x512xbf16>, vector<16x512xf32> -> vector<16x512xf32>
    %8 = arith.addf %3, %7 : vector<16x512xf32>
    %c0_6 = arith.constant 0 : index
    %c0_7 = arith.constant 0 : index
    %9 = vector.load %arg8[%c0_6, %c0_7] : memref<16x512xf32, #tpu.memory_space<vmem>>, vector<16x512xf32>
    tpu.vector_store %arg8[%c0_6, %c0_7], %8 {strides = array<i32>} : memref<16x512xf32, #tpu.memory_space<vmem>>, vector<16x512xf32>,
    %c0_i32_8 = arith.constant 0 : i32
    %10 = arith.cmpi eq, %arg1, %c0_i32_8 : i32
    %11 = arith.extui %10 : i1 to i32
    %c0_i32_9 = arith.constant 0 : i32
    %12 = arith.cmpi ne, %11, %c0_i32_9 : i32
    scf.if %12 {
      %c0_10 = arith.constant 0 : index
      %c0_11 = arith.constant 0 : index
      %13 = vector.load %arg8[%c0_10, %c0_11] : memref<16x512xf32, #tpu.memory_space<vmem>>, vector<16x512xf32>
      %c0_12 = arith.constant 0 : index
      %c0_13 = arith.constant 0 : index
      %14 = vector.load %arg4[%c0_12, %c0_13] : memref<1x512xf32, #tpu.memory_space<vmem>>, vector<1x512xf32>
      %15 = vector.broadcast %14 : vector<1x512xf32> to vector<16x512xf32>
      %16 = arith.addf %13, %15 : vector<16x512xf32>
      %cst_14 = arith.constant 0.000000e+00 : f32
      %17 = vector.broadcast %cst_14 : f32 to vector<16x512xf32>
      %18 = arith.maximumf %16, %17 : vector<16x512xf32>
      %19 = arith.truncf %18 : vector<16x512xf32> to vector<16x512xbf16>
      %c0_15 = arith.constant 0 : index
      %c0_16 = arith.constant 0 : index
      %20 = vector.load %arg5[%c0_15, %c0_16] : memref<512x128xbf16, #tpu.memory_space<vmem>>, vector<512x128xbf16>
      %cst_17 = arith.constant dense<0.000000e+00> : vector<16x128xf32>
      %21 = tpu.matmul %19, %20, %cst_17 {dimension_numbers = #tpu.dot_dimension_numbers<[1], [0], [0], [1], [0, 0, 1, 1], [], []>} : vector<16x512xbf16>, vector<512x128xbf16>, vector<16x128xf32> -> vector<16x128xf32>
      %c0_18 = arith.constant 0 : index
      %c0_19 = arith.constant 0 : index
      %22 = vector.load %arg6[%c0_18, %c0_19] : memref<1x128xf32, #tpu.memory_space<vmem>>, vector<1x128xf32>
      %23 = vector.broadcast %22 : vector<1x128xf32> to vector<16x128xf32>
      %24 = arith.addf %21, %23 : vector<16x128xf32>
      %25 = tpu.iota {dimensions = array<i32: 1>} : vector<16x128xi32>
      %c11_i32 = arith.constant 11 : i32
      %26 = vector.broadcast %c11_i32 : i32 to vector<16x128xi32>
      %27 = arith.cmpi slt, %25, %26 : vector<16x128xi32>
      %cst_20 = arith.constant -1.000000e+30 : f32
      %28 = vector.broadcast %cst_20 : f32 to vector<16x128xf32>
      %29 = arith.select %27, %24, %28 : vector<16x128xi1>, vector<16x128xf32>
      %cst_21 = arith.constant dense<0xFF800000> : vector<16xf32>
      %30 = vector.multi_reduction <maximumf>, %29, %cst_21 [1] : vector<16x128xf32> to vector<16xf32>
      %31 = vector.shape_cast %30 : vector<16xf32> to vector<16x1xf32>
      %32 = vector.broadcast %31 : vector<16x1xf32> to vector<16x128xf32>
      %33 = arith.subf %29, %32 : vector<16x128xf32>
      %34 = math.exp %33 : vector<16x128xf32>
      %cst_22 = arith.constant dense<0.000000e+00> : vector<16xf32>
      %35 = vector.multi_reduction <add>, %34, %cst_22 [1] : vector<16x128xf32> to vector<16xf32>
      %36 = vector.shape_cast %35 : vector<16xf32> to vector<16x1xf32>
      %37 = math.log %36 : vector<16x1xf32>
      %38 = vector.broadcast %37 : vector<16x1xf32> to vector<16x128xf32>
      %39 = arith.subf %33, %38 : vector<16x128xf32>
      %c0_23 = arith.constant 0 : index
      %c0_24 = arith.constant 0 : index
      %40 = vector.load %arg7[%c0_23, %c0_24] : memref<16x128xf32, #tpu.memory_space<vmem>>, vector<16x128xf32>
      tpu.vector_store %arg7[%c0_23, %c0_24], %39 {strides = array<i32>} : memref<16x128xf32, #tpu.memory_space<vmem>>, vector<16x128xf32>,
    } else {
    }
    return
  }
  func.func @transform_0(%arg0: i32, %arg1: i32) -> (i32, i32) {
    %c0_i32 = arith.constant 0 : i32
    return %arg0, %arg1 : i32, i32
  }
  func.func @transform_1(%arg0: i32, %arg1: i32) -> (i32, i32) {
    %c0_i32 = arith.constant 0 : i32
    %c0_i32_0 = arith.constant 0 : i32
    return %arg1, %c0_i32 : i32, i32
  }
  func.func @transform_2(%arg0: i32, %arg1: i32) -> (i32, i32) {
    %c0_i32 = arith.constant 0 : i32
    %c0_i32_0 = arith.constant 0 : i32
    %c0_i32_1 = arith.constant 0 : i32
    return %c0_i32, %c0_i32_0 : i32, i32
  }
  func.func @transform_3(%arg0: i32, %arg1: i32) -> (i32, i32) {
    %c0_i32 = arith.constant 0 : i32
    %c0_i32_0 = arith.constant 0 : i32
    %c0_i32_1 = arith.constant 0 : i32
    return %c0_i32, %c0_i32_0 : i32, i32
  }
  func.func @transform_4(%arg0: i32, %arg1: i32) -> (i32, i32) {
    %c0_i32 = arith.constant 0 : i32
    %c0_i32_0 = arith.constant 0 : i32
    %c0_i32_1 = arith.constant 0 : i32
    return %c0_i32, %c0_i32_0 : i32, i32
  }
  func.func @transform_5(%arg0: i32, %arg1: i32) -> (i32, i32) {
    %c0_i32 = arith.constant 0 : i32
    %c0_i32_0 = arith.constant 0 : i32
    return %arg0, %c0_i32 : i32, i32
  }
}

</mosaic_0001>

<bundles_post_ra>
// kernel: tpu_custom_call.1
= control target key start
LH: loop header
LB: loop body
LE: loop exit
PB: predicated region body
PF: predicated region fallthrough
CT: control target
= control target key end

     0   :  { %10 = vsyncpa [#allocation4], 0  ;;  %s3693_s0 = inlined_call_operand.hbm [shape: f32[2,1024], index: 0, kind: input, shape index: {}]   ;;  %s3694_s1 = inlined_call_operand.hbm [shape: bf16[1024,512], index: 1, kind: input, shape index: {}]   ;;  %s3695_s2 = inlined_call_operand.hbm [shape: f32[1,512], index: 2, kind: input, shape index: {}]   ;;  %s3696_s3 = inlined_call_operand.hbm [shape: bf16[512,128], index: 3, kind: input, shape index: {}]   ;;  %s3697_s4 = inlined_call_operand.vmem [shape: f32[1,128], index: 4, kind: input, shape index: {}]   ;;  %s3698_s5 = inlined_call_operand.hbm [shape: f32[2,128], index: 5, kind: output, shape index: {}]  }
   0x1   :  { %11 = vsyncpa [#allocation7], 0 }
   0x2   :  { %12 = vsyncpa [#allocation10], 0 }
   0x3   :  { %13 = vsyncpa [#allocation5], 0 }
   0x4   :  { %18 = vsyncadd [#allocation4], 1792  ;;  %s3536_s18 = smov [#allocation6]   ;;  %s3537_s20 = smov [#allocation3]  }
   0x5   :  { %s31_s19 = sshll.u32 %s3536_s18, 4  ;;  %s19_s21 = sshll.u32 %s3537_s20, 4  ;;  %s32_s19 = int_to_ptr.vmem [resolvable:$true] %s31_s19  ;;  %s20_s21 = int_to_ptr.vmem [resolvable:$true] %s19_s21 }
   0x6   :  { %s3436_s22 = scalar_lea.vmem %s32_s19, 32768  ;;  %p3441_p1 = scmp.lt.s32.totalorder %s32_s19, %s32_s19 }
   0x7   :  { %p3437_p0 = scmp.ne.s32.totalorder %s32_s19, %s3436_s22  ;;  %p3442_p2 = scmp.lt.s32.totalorder %s3436_s22, %s3436_s22 }
   0x9   :  { %p3443_p3 = por %p3442_p2, %p3441_p1 }
   0xb   :  { %p3444_p4 = pnand %p3443_p3, %p3437_p0 }
   0xd   :  { %3447 = shalt.err (!%p3444_p4)
}
   0xe   :  { %s3538_s23 = smov 256   ;;  %s3539_s24 = smov 16  }
   0xf   :  { %37 = dma.hbm_to_vmem [thread:$0]  %s3694_s1, 32768, %s32_s19, [#allocation7], %s3538_s23, %s3538_s23, %s3539_s24  }
  0x10   :  { %s3456_s27 = scalar_lea.vmem %s20_s21, 256  ;;  %s3460_s28 = scalar_lea.vmem %s20_s21, 2048 }
  0x11   :  { %p3457_p5 = scmp.ne.s32.totalorder %s20_s21, %s3456_s27  ;;  %p3461_p6 = scmp.lt.s32.totalorder %s20_s21, %s20_s21 }
  0x12   :  { %p3462_p7 = scmp.lt.s32.totalorder %s3460_s28, %s3456_s27 }
  0x14   :  { %p3463_p8 = por %p3462_p7, %p3461_p6 }
  0x16   :  { %p3464_p9 = pnand %p3463_p8, %p3457_p5 }
  0x18   :  { %3467 = shalt.err (!%p3464_p9)
}
  0x19   :  { %25 = dma.hbm_to_vmem [thread:$0]  %s3693_s0, 256, %s20_s21, [#allocation4], %s3538_s23, %s3538_s23, %s3539_s24  }
  0x1a   :  { %s3540_s6 = smov [#allocation8]   ;;  %s3541_s8 = smov [#allocation9]  }
  0x1b   :  { %s44_s7 = sshll.u32 %s3540_s6, 4  ;;  %s53_s9 = sshll.u32 %s3541_s8, 4  ;;  %s45_s7 = int_to_ptr.vmem [resolvable:$true] %s44_s7  ;;  %s54_s9 = int_to_ptr.vmem [resolvable:$true] %s53_s9 }
  0x1c   :  { %s3476_s10 = scalar_lea.vmem %s45_s7, 64  ;;  %p3481_p11 = scmp.lt.s32.totalorder %s45_s7, %s45_s7 }
  0x1d   :  { %p3477_p10 = scmp.ne.s32.totalorder %s45_s7, %s3476_s10  ;;  %p3482_p12 = scmp.lt.s32.totalorder %s3476_s10, %s3476_s10 }
  0x1f   :  { %p3483_p13 = por %p3482_p12, %p3481_p11 }
  0x21   :  { %p3484_p0 = pnand %p3483_p13, %p3477_p10 }
  0x23   :  { %3487 = shalt.err (!%p3484_p0)
}
  0x24   :  { %47 = dma.hbm_to_vmem [thread:$0]  %s3695_s2, 64, %s45_s7, [#allocation7]  }
  0x25   :  { %s3496_s12 = scalar_lea.vmem %s54_s9, 4096  ;;  %p3501_p2 = scmp.lt.s32.totalorder %s54_s9, %s54_s9 }
  0x26   :  { %p3497_p1 = scmp.ne.s32.totalorder %s54_s9, %s3496_s12  ;;  %p3502_p3 = scmp.lt.s32.totalorder %s3496_s12, %s3496_s12 }
  0x28   :  { %p3503_p4 = por %p3502_p3, %p3501_p2 }
  0x2a   :  { %p3504_p5 = pnand %p3503_p4, %p3497_p1 }
  0x2c   :  { %3507 = shalt.err (!%p3504_p5)
}
  0x2d   :  { %s3542_s0 = smov 64   ;;  %s3543_s13 = smov 4  }
  0x2e   :  { %59 = dma.hbm_to_vmem [thread:$0]  %s3696_s3, 4096, %s54_s9, [#allocation10], %s3542_s0, %s3542_s0, %s3543_s13  }
  0x2f   :  { %3528 = dma.done.wait [#allocation4], 2048  }
  0x30   :  { %3529 = vsyncadd [#allocation4], 4294965248 }
  0x31   :  { %3530 = dma.done.wait [#allocation7], 32832  }
  0x32   :  { %3531 = vsyncadd [#allocation7], 4294934464 }
  0x33   :  { %3532 = dma.done.wait [#allocation10], 4096  }
  0x34   :  { %3533 = vsyncadd [#allocation10], 4294963200  ;;  %v2980_v0 = vld [vmem:[#allocation6 + $0xe4] ss:$16 sps:$4 sm:$0xff]   ;;  %v2984_v2 = vld [vmem:[#allocation6 + $0xe0] ss:$16 sps:$4 sm:$0xff]   ;;  %v134_v41 = vlaneseq }
  0x35   :  { %v2982_v1 = vld [vmem:[#allocation6 + $0x2e4] ss:$16 sps:$4 sm:$0xff]   ;;  %1831 = vmatprep.subr.bf16.mxu0 %v2980_v0  ;;  %v2985_v3 = vld [vmem:[#allocation6 + $0x2e0] ss:$16 sps:$4 sm:$0xff]   ;;  %v3544_v39 = vmov 1983009808  }
  0x36   :  { %1874 = vmatprep.subr.bf16.mxu1 %v2982_v1  ;;  %v2986_v4 = vld [vmem:[#allocation6 + $0xc4] ss:$16 sps:$4 sm:$0xff]   ;;  %1832 = vmatpush1.bf16.msra.mxu0 %v2984_v2  ;;  %v2990_v6 = vld [vmem:[#allocation6 + $0xc0] ss:$16 sps:$4 sm:$0xff]   ;;  %v132_v40 = vunpack.c.l.s4 %v3544_v39  ;;  %v3591_v48 = vshrl.u32 %v134_v41, 7 }
  0x37   :  { %1875 = vmatpush1.bf16.msra.mxu1 %v2985_v3  ;;  %v2988_v5 = vld [vmem:[#allocation6 + $0x2c4] ss:$16 sps:$4 sm:$0xff]   ;;  %1833 = vmatprep.subr.bf16.mxu0 %v2986_v4  ;;  %v2991_v7 = vld [vmem:[#allocation6 + $0x2c0] ss:$16 sps:$4 sm:$0xff]  }
  0x38   :  { %1876 = vmatprep.subr.bf16.mxu1 %v2988_v5  ;;  %v2992_v8 = vld [vmem:[#allocation6 + $0xa4] ss:$16 sps:$4 sm:$0xff]   ;;  %v2996_v10 = vld [vmem:[#allocation6 + $0xa0] ss:$16 sps:$4 sm:$0xff]   ;;  %v133_v47 = vunpack.c.0.s8 %v132_v40 }
  0x39   :  { %v2994_v9 = vld [vmem:[#allocation6 + $0x2a4] ss:$16 sps:$4 sm:$0xff]   ;;  %v2997_v11 = vld [vmem:[#allocation6 + $0x2a0] ss:$16 sps:$4 sm:$0xff]  }
  0x3a   :  { %1834 = vmatpush1.bf16.msra.mxu0 %v2990_v6  ;;  %v2998_v12 = vld [vmem:[#allocation6 + $0x84] ss:$16 sps:$4 sm:$0xff]   ;;  %v3002_v14 = vld [vmem:[#allocation6 + $0x80] ss:$16 sps:$4 sm:$0xff]   ;;  %v3594_v55 = vsub.s32 %v133_v47, %v3591_v48 }
  0x3b   :  { %1877 = vmatpush1.bf16.msra.mxu1 %v2991_v7  ;;  %1835 = vmatprep.subr.bf16.mxu0 %v2992_v8  ;;  %v3000_v13 = vld [vmem:[#allocation6 + $0x284] ss:$16 sps:$4 sm:$0xff]   ;;  %v3003_v15 = vld [vmem:[#allocation6 + $0x280] ss:$16 sps:$4 sm:$0xff]  }
  0x3c   :  { %1878 = vmatprep.subr.bf16.mxu1 %v2994_v9  ;;  %v3004_v16 = vld [vmem:[#allocation6 + $0x64] ss:$16 sps:$4 sm:$0xff]   ;;  %v3008_v18 = vld [vmem:[#allocation6 + $0x60] ss:$16 sps:$4 sm:$0xff]  }
  0x3d   :  { %v3006_v17 = vld [vmem:[#allocation6 + $0x264] ss:$16 sps:$4 sm:$0xff]   ;;  %v3009_v19 = vld [vmem:[#allocation6 + $0x260] ss:$16 sps:$4 sm:$0xff]  }
  0x3e   :  { %1836 = vmatpush1.bf16.msra.mxu0 %v2996_v10  ;;  %v3010_v20 = vld [vmem:[#allocation6 + $0x44] ss:$16 sps:$4 sm:$0xff]   ;;  %v3014_v22 = vld [vmem:[#allocation6 + $0x40] ss:$16 sps:$4 sm:$0xff]  }
  0x3f   :  { %1879 = vmatpush1.bf16.msra.mxu1 %v2997_v11  ;;  %1837 = vmatprep.subr.bf16.mxu0 %v2998_v12  ;;  %v3012_v21 = vld [vmem:[#allocation6 + $0x244] ss:$16 sps:$4 sm:$0xff]   ;;  %v3015_v23 = vld [vmem:[#allocation6 + $0x240] ss:$16 sps:$4 sm:$0xff]  }
  0x40   :  { %1880 = vmatprep.subr.bf16.mxu1 %v3000_v13  ;;  %v3016_v24 = vld [vmem:[#allocation6 + $0x24] ss:$16 sps:$4 sm:$0xff]   ;;  %v3020_v26 = vld [vmem:[#allocation6 + $0x20] ss:$16 sps:$4 sm:$0xff]  }
  0x41   :  { %v3018_v25 = vld [vmem:[#allocation6 + $0x224] ss:$16 sps:$4 sm:$0xff]   ;;  %v3021_v27 = vld [vmem:[#allocation6 + $0x220] ss:$16 sps:$4 sm:$0xff]  }
  0x42   :  { %1838 = vmatpush1.bf16.msra.mxu0 %v3002_v14  ;;  %v3022_v28 = vld [vmem:[#allocation6 + $0x4] ss:$16 sps:$4 sm:$0xff]   ;;  %v3026_v30 = vld [vmem:[#allocation6] ss:$16 sps:$4 sm:$0xff]  }
  0x43   :  { %1881 = vmatpush1.bf16.msra.mxu1 %v3003_v15  ;;  %1839 = vmatprep.subr.bf16.mxu0 %v3004_v16  ;;  %v3024_v29 = vld [vmem:[#allocation6 + $0x204] ss:$16 sps:$4 sm:$0xff]   ;;  %v3027_v31 = vld [vmem:[#allocation6 + $0x200] ss:$16 sps:$4 sm:$0xff]  }
  0x44   :  { %1882 = vmatprep.subr.bf16.mxu1 %v3006_v17  ;;  %v3028_v32 = vld [vmem:[#allocation6 + $0x1e4] ss:$16 sps:$4 sm:$0xff]   ;;  %v3032_v34 = vld [vmem:[#allocation6 + $0x1e0] ss:$16 sps:$4 sm:$0xff]  }
  0x45   :  { %v3030_v33 = vld [vmem:[#allocation6 + $0x3e4] ss:$16 sps:$4 sm:$0xff]   ;;  %v3033_v35 = vld [vmem:[#allocation6 + $0x3e0] ss:$16 sps:$4 sm:$0xff]  }
  0x46   :  { %1840 = vmatpush1.bf16.msra.mxu0 %v3008_v18  ;;  %v3034_v36 = vld [vmem:[#allocation6 + $0x1c4] ss:$16 sps:$4 sm:$0xff]   ;;  %v3038_v38 = vld [vmem:[#allocation6 + $0x1c0] ss:$16 sps:$4 sm:$0xff]  }
  0x47   :  { %1883 = vmatpush1.bf16.msra.mxu1 %v3009_v19  ;;  %1841 = vmatprep.subr.bf16.mxu0 %v3010_v20  ;;  %v3036_v37 = vld [vmem:[#allocation6 + $0x3c4] ss:$16 sps:$4 sm:$0xff]   ;;  %v3039_v42 = vld [vmem:[#allocation6 + $0x3c0] ss:$16 sps:$4 sm:$0xff]  }
  0x48   :  { %1884 = vmatprep.subr.bf16.mxu1 %v3012_v21  ;;  %v3040_v43 = vld [vmem:[#allocation6 + $0x1a4] ss:$16 sps:$4 sm:$0xff]   ;;  %v3044_v45 = vld [vmem:[#allocation6 + $0x1a0] ss:$16 sps:$4 sm:$0xff]  }
  0x49   :  { %v3042_v44 = vld [vmem:[#allocation6 + $0x3a4] ss:$16 sps:$4 sm:$0xff]   ;;  %v3045_v46 = vld [vmem:[#allocation6 + $0x3a0] ss:$16 sps:$4 sm:$0xff]  }
  0x4a   :  { %1842 = vmatpush1.bf16.msra.mxu0 %v3014_v22  ;;  %v3046_v49 = vld [vmem:[#allocation6 + $0x184] ss:$16 sps:$4 sm:$0xff]   ;;  %v3050_v51 = vld [vmem:[#allocation6 + $0x180] ss:$16 sps:$4 sm:$0xff]  }
  0x4b   :  { %1885 = vmatpush1.bf16.msra.mxu1 %v3015_v23  ;;  %1843 = vmatprep.subr.bf16.mxu0 %v3016_v24  ;;  %v3048_v50 = vld [vmem:[#allocation6 + $0x384] ss:$16 sps:$4 sm:$0xff]   ;;  %v3051_v52 = vld [vmem:[#allocation6 + $0x380] ss:$16 sps:$4 sm:$0xff]  }
  0x4c   :  { %1886 = vmatprep.subr.bf16.mxu1 %v3018_v25  ;;  %v3052_v53 = vld [vmem:[#allocation6 + $0x164] ss:$16 sps:$4 sm:$0xff]   ;;  %v3076_v56 = vld [vmem:[#allocation3] ss:$16 sps:$4 sm:$0xff]  }
  0x4d   :  { %v3054_v54 = vld [vmem:[#allocation6 + $0x364] ss:$16 sps:$4 sm:$0xff]   ;;  %v3078_v57 = vld [vmem:[#allocation3 + $0x20] ss:$16 sps:$4 sm:$0xff]   ;;  %v137_v63 = vrot.slane %v3076_v56, %v3594_v55 }
  0x4e   :  { %1844 = vmatpush1.bf16.msra.mxu0 %v3020_v26  ;;  %v3056_v58 = vld [vmem:[#allocation6 + $0x160] ss:$16 sps:$4 sm:$0xff]   ;;  %v3084_v62 = vld [vmem:[#allocation3 + $0x4] ss:$16 sps:$4 sm:$0xff]   ;;  %v151_v0 = vrot.slane %v3078_v57, %v3594_v55 }
  0x4f   :  { %1887 = vmatpush1.bf16.msra.mxu1 %v3021_v27  ;;  %1845 = vmatprep.subr.bf16.mxu0 %v3022_v28  ;;  %v3057_v59 = vld [vmem:[#allocation6 + $0x360] ss:$16 sps:$4 sm:$0xff]   ;;  %v3085_v1 = vld [vmem:[#allocation3 + $0x24] ss:$16 sps:$4 sm:$0xff]   ;;  %v144_v7 = vrot.slane %v3084_v62, %v3594_v55 }
  0x50   :  { %1888 = vmatprep.subr.bf16.mxu1 %v3024_v29  ;;  %v3080_v60 = vld [vmem:[#allocation3 + $0x40] ss:$16 sps:$4 sm:$0xff]   ;;  %v3086_v2 = vld [vmem:[#allocation3 + $0x44] ss:$16 sps:$4 sm:$0xff]   ;;  %v160_v9 = vcombine.high %v137_v63, %v151_v0  ;;  %v158_v10 = vrot.slane %v3085_v1, %v3594_v55  ;;  %v159_v28 = vcombine.low %v137_v63, %v151_v0 }
  0x51   :  { %v3082_v61 = vld [vmem:[#allocation3 + $0x60] ss:$16 sps:$4 sm:$0xff]   ;;  %v3087_v3 = vld [vmem:[#allocation3 + $0x64] ss:$16 sps:$4 sm:$0xff]   ;;  %v209_v5 = vrot.slane %v3080_v60, %v3594_v55  ;;  %v216_v11 = vrot.slane %v3086_v2, %v3594_v55 }
  0x52   :  { %1846 = vmatpush1.bf16.msra.mxu0 %v3026_v30  ;;  %v3058_v4 = vld [vmem:[#allocation6 + $0x144] ss:$16 sps:$4 sm:$0xff]   ;;  %v223_v6 = vrot.slane %v3082_v61, %v3594_v55  ;;  %v230_v13 = vrot.slane %v3087_v3, %v3594_v55  ;;  %v3062_v14 = vld [vmem:[#allocation6 + $0x140] ss:$16 sps:$4 sm:$0xff]   ;;  %v162_v16 = vcombine.high %v144_v7, %v158_v10  ;;  %v161_v30 = vcombine.low %v144_v7, %v158_v10  ;;  %v3184_v7 = vld [vmem:[#allocation3 + $0x8] ss:$16 sps:$4 sm:$0xff]  }
  0x53   :  { %1889 = vmatpush1.bf16.msra.mxu1 %v3027_v31  ;;  %1847 = vmatprep.subr.bf16.mxu0 %v3028_v32  ;;  %v3060_v8 = vld [vmem:[#allocation6 + $0x344] ss:$16 sps:$4 sm:$0xff]   ;;  %v3063_v15 = vld [vmem:[#allocation6 + $0x340] ss:$16 sps:$4 sm:$0xff]  }
  0x54   :  { %1890 = vmatprep.subr.bf16.mxu1 %v3030_v33  ;;  %v232_v12 = vcombine.high %v209_v5, %v223_v6  ;;  %v3064_v17 = vld [vmem:[#allocation6 + $0x124] ss:$16 sps:$4 sm:$0xff]   ;;  %v234_v19 = vcombine.high %v216_v11, %v230_v13  ;;  %v3068_v22 = vld [vmem:[#allocation6 + $0x120] ss:$16 sps:$4 sm:$0xff]   ;;  %v231_v29 = vcombine.low %v209_v5, %v223_v6  ;;  %v233_v31 = vcombine.low %v216_v11, %v230_v13  ;;  %v3188_v11 = vld [vmem:[#allocation3 + $0x48] ss:$16 sps:$4 sm:$0xff]  }
  0x55   :  { %v3066_v20 = vld [vmem:[#allocation6 + $0x324] ss:$16 sps:$4 sm:$0xff]   ;;  %v3069_v23 = vld [vmem:[#allocation6 + $0x320] ss:$16 sps:$4 sm:$0xff]   ;;  %v3192_v13 = vld [vmem:[#allocation3 + $0xc] ss:$16 sps:$4 sm:$0xff]  }
  0x56   :  { %1848 = vmatpush2.bf16.msra.mxu0 %v3032_v34  ;;  %v3604_v18 = vpack.c.bf16 %v232_v12, %v160_v9  ;;  %v3607_v21 = vpack.c.bf16 %v234_v19, %v162_v16  ;;  %v3070_v24 = vld [vmem:[#allocation6 + $0x104] ss:$16 sps:$4 sm:$0xff]   ;;  %v3074_v26 = vld [vmem:[#allocation6 + $0x100] ss:$16 sps:$4 sm:$0xff]   ;;  %v3610_v34 = vpack.c.bf16 %v231_v29, %v159_v28  ;;  %v3190_v12 = vld [vmem:[#allocation3 + $0x68] ss:$16 sps:$4 sm:$0xff]  }
  0x57   :  { %1891 = vmatpush2.bf16.msra.mxu1 %v3033_v35  ;;  %1849 = vmatprep.subr.bf16.mxu0 %v3034_v36  ;;  %v3072_v25 = vld [vmem:[#allocation6 + $0x304] ss:$16 sps:$4 sm:$0xff]   ;;  %v3075_v27 = vld [vmem:[#allocation6 + $0x300] ss:$16 sps:$4 sm:$0xff]   ;;  %v3612_v35 = vpack.c.bf16 %v233_v31, %v161_v30  ;;  %v3193_v16 = vld [vmem:[#allocation3 + $0x2c] ss:$16 sps:$4 sm:$0xff]  }
  0x58   :  { %1892 = vmatprep.subr.bf16.mxu1 %v3036_v37  ;;  %1863 = vmatprep.mubr.bf16.mxu0 %v3604_v18  ;;  %v3090_v32 = vld [vmem:[#allocation6 + $0x4e4] ss:$16 sps:$4 sm:$0xff]   ;;  %v3088_v36 = vld [vmem:[#allocation6 + $0x4e0] ss:$16 sps:$4 sm:$0xff]   ;;  %v3195_v19 = vld [vmem:[#allocation3 + $0x6c] ss:$16 sps:$4 sm:$0xff]  }
  0x59   :  { %1906 = vmatprep.mubr.bf16.mxu1 %v3607_v21  ;;  %v3093_v33 = vld [vmem:[#allocation6 + $0x6e4] ss:$16 sps:$4 sm:$0xff]   ;;  %v3091_v37 = vld [vmem:[#allocation6 + $0x6e0] ss:$16 sps:$4 sm:$0xff]   ;;  %v3642_v30 = vrot.slane %v3195_v19, %v3594_v55  ;;  %v3211_v19 = vld [vmem:[#allocation6 + $0x2a8] ss:$16 sps:$4 sm:$0xff]  }
  0x5a   :  { %1850 = vmatpush2.bf16.msra.mxu0 %v3038_v38  ;;  %v3096_v38 = vld [vmem:[#allocation6 + $0x4c4] ss:$16 sps:$4 sm:$0xff]   ;;  %v3094_v40 = vld [vmem:[#allocation6 + $0x4c0] ss:$16 sps:$4 sm:$0xff]  }
  0x5b   :  { %1893 = vmatpush2.bf16.msra.mxu1 %v3039_v42  ;;  %1851 = vmatprep.subr.bf16.mxu0 %v3040_v43  ;;  %v3099_v39 = vld [vmem:[#allocation6 + $0x6c4] ss:$16 sps:$4 sm:$0xff]   ;;  %v3097_v42 = vld [vmem:[#allocation6 + $0x6c0] ss:$16 sps:$4 sm:$0xff]  }
  0x5c   :  { %1894 = vmatprep.subr.bf16.mxu1 %v3042_v44  ;;  %v3102_v43 = vld [vmem:[#allocation6 + $0x4a4] ss:$16 sps:$4 sm:$0xff]   ;;  %v3115_v56 = vld [vmem:[#allocation6 + $0x660] ss:$16 sps:$4 sm:$0xff]  }
  0x5d   :  { %v3105_v44 = vld [vmem:[#allocation6 + $0x6a4] ss:$16 sps:$4 sm:$0xff]   ;;  %v3121_v60 = vld [vmem:[#allocation6 + $0x640] ss:$16 sps:$4 sm:$0xff]  }
  0x5e   :  { %1852 = vmatpush2.bf16.msra.mxu0 %v3044_v45  ;;  %v3100_v45 = vld [vmem:[#allocation6 + $0x4a0] ss:$16 sps:$4 sm:$0xff]   ;;  %v3108_v47 = vld [vmem:[#allocation6 + $0x484] ss:$16 sps:$4 sm:$0xff]  }
  0x5f   :  { %1895 = vmatpush2.bf16.msra.mxu1 %v3045_v46  ;;  %1853 = vmatprep.subr.bf16.mxu0 %v3046_v49  ;;  %v3103_v46 = vld [vmem:[#allocation6 + $0x6a0] ss:$16 sps:$4 sm:$0xff]   ;;  %v3111_v49 = vld [vmem:[#allocation6 + $0x684] ss:$16 sps:$4 sm:$0xff]  }
  0x60   :  { %1896 = vmatprep.subr.bf16.mxu1 %v3048_v50  ;;  %v3106_v50 = vld [vmem:[#allocation6 + $0x480] ss:$16 sps:$4 sm:$0xff]   ;;  %v3120_v57 = vld [vmem:[#allocation6 + $0x444] ss:$16 sps:$4 sm:$0xff]  }
  0x61   :  { %v3126_v61 = vld [vmem:[#allocation6 + $0x424] ss:$16 sps:$4 sm:$0xff]   ;;  %v3124_v63 = vld [vmem:[#allocation6 + $0x420] ss:$16 sps:$4 sm:$0xff]  }
  0x62   :  { %1854 = vmatpush2.bf16.msra.mxu0 %v3050_v51  ;;  %v3109_v51 = vld [vmem:[#allocation6 + $0x680] ss:$16 sps:$4 sm:$0xff]   ;;  %v3129_v62 = vld [vmem:[#allocation6 + $0x624] ss:$16 sps:$4 sm:$0xff]  }
  0x63   :  { %1897 = vmatpush2.bf16.msra.mxu1 %v3051_v52  ;;  %1855 = vmatprep.subr.bf16.mxu0 %v3052_v53  ;;  %v3114_v52 = vld [vmem:[#allocation6 + $0x464] ss:$16 sps:$4 sm:$0xff]   ;;  %v3127_v0 = vld [vmem:[#allocation6 + $0x620] ss:$16 sps:$4 sm:$0xff]  }
  0x64   :  { %1898 = vmatprep.subr.bf16.mxu1 %v3054_v54  ;;  %v3117_v53 = vld [vmem:[#allocation6 + $0x664] ss:$16 sps:$4 sm:$0xff]   ;;  %v3112_v54 = vld [vmem:[#allocation6 + $0x460] ss:$16 sps:$4 sm:$0xff]  }
  0x65   :  { %v3132_v1 = vld [vmem:[#allocation6 + $0x404] ss:$16 sps:$4 sm:$0xff]   ;;  %v3130_v3 = vld [vmem:[#allocation6 + $0x400] ss:$16 sps:$4 sm:$0xff]  }
  0x66   :  { %1856 = vmatpush2.bf16.msra.mxu0 %v3056_v58  ;;  %v3123_v58 = vld [vmem:[#allocation6 + $0x644] ss:$16 sps:$4 sm:$0xff]   ;;  %v3136_v9 = vld [vmem:[#allocation6 + $0x5e0] ss:$16 sps:$4 sm:$0xff]  }
  0x67   :  { %1899 = vmatpush2.bf16.msra.mxu1 %v3057_v59  ;;  %1857 = vmatprep.subr.bf16.mxu0 %v3058_v4  ;;  %v3118_v59 = vld [vmem:[#allocation6 + $0x440] ss:$16 sps:$4 sm:$0xff]   ;;  %v3135_v2 = vld [vmem:[#allocation6 + $0x604] ss:$16 sps:$4 sm:$0xff]  }
  0x68   :  { %1900 = vmatprep.subr.bf16.mxu1 %v3060_v8  ;;  %v3133_v4 = vld [vmem:[#allocation6 + $0x600] ss:$16 sps:$4 sm:$0xff]   ;;  %v3138_v5 = vld [vmem:[#allocation6 + $0x5e4] ss:$16 sps:$4 sm:$0xff]   ;;  %v3186_v8 = vld [vmem:[#allocation3 + $0x28] ss:$16 sps:$4 sm:$0xff]  }
  0x69   :  { %v3141_v6 = vld [vmem:[#allocation6 + $0x7e4] ss:$16 sps:$4 sm:$0xff]   ;;  %v3139_v10 = vld [vmem:[#allocation6 + $0x7e0] ss:$16 sps:$4 sm:$0xff]  }
  0x6a   :  { %1858 = vmatpush2.bf16.msra.mxu0 %v3062_v14  ;;  %v3617_v14 = vrot.slane %v3184_v7, %v3594_v55  ;;  %v3142_v31 = vld [vmem:[#allocation6 + $0x5c0] ss:$16 sps:$4 sm:$0xff]  }
  0x6b   :  { %1901 = vmatpush2.bf16.msra.mxu1 %v3063_v15  ;;  %1859 = vmatprep.subr.bf16.mxu0 %v3064_v17  ;;  %v3620_v15 = vrot.slane %v3186_v8, %v3594_v55  ;;  %v3194_v17 = vld [vmem:[#allocation3 + $0x4c] ss:$16 sps:$4 sm:$0xff]  }
  0x6c   :  { %1902 = vmatprep.subr.bf16.mxu1 %v3066_v20  ;;  %v3144_v20 = vld [vmem:[#allocation6 + $0x5c4] ss:$16 sps:$4 sm:$0xff]   ;;  %v3637_v28 = vrot.slane %v3194_v17, %v3594_v55  ;;  %v3208_v17 = vld [vmem:[#allocation6 + $0xa8] ss:$16 sps:$4 sm:$0xff]  }
  0x6e   :  { %1860 = vmatpush2.bf16.msra.mxu0 %v3068_v22  ;;  %v3623_v22 = vrot.slane %v3188_v11, %v3594_v55  ;;  %v3204_v11 = vld [vmem:[#allocation6 + $0xcc] ss:$16 sps:$4 sm:$0xff]  }
  0x6f   :  { %1903 = vmatpush2.bf16.msra.mxu1 %v3069_v23  ;;  %1861 = vmatprep.subr.bf16.mxu0 %v3070_v24  ;;  %v3626_v23 = vrot.slane %v3190_v12, %v3594_v55  ;;  %v3629_v24 = vrot.slane %v3192_v13, %v3594_v55  ;;  %v3207_v12 = vld [vmem:[#allocation6 + $0x2cc] ss:$16 sps:$4 sm:$0xff]   ;;  %v3202_v13 = vld [vmem:[#allocation6 + $0xc8] ss:$16 sps:$4 sm:$0xff]  }
  0x70   :  { %1904 = vmatprep.subr.bf16.mxu1 %v3072_v25  ;;  %v3147_v25 = vld [vmem:[#allocation6 + $0x7c4] ss:$16 sps:$4 sm:$0xff]  }
  0x71   :  { %v268_v29 = vcombine.high %v3623_v22, %v3626_v23 }
  0x72   :  { %1862 = vmatpush2.bf16.msra.mxu0 %v3074_v26  ;;  %v196_v26 = vcombine.high %v3617_v14, %v3620_v15 }
  0x73   :  { %1905 = vmatpush2.bf16.msra.mxu1 %v3075_v27  ;;  %1917 = vmatprep.subr.bf16.mxu0 %v3090_v32  ;;  %v3634_v27 = vrot.slane %v3193_v16, %v3594_v55  ;;  %v3145_v32 = vld [vmem:[#allocation6 + $0x7c0] ss:$16 sps:$4 sm:$0xff]   ;;  %v3213_v16 = vld [vmem:[#allocation6 + $0x2ac] ss:$16 sps:$4 sm:$0xff]  }
  0x74   :  { %1960 = vmatprep.subr.bf16.mxu1 %v3093_v33 }
  0x75   :  { %1864 = vmatmul.mubr.bf16.vlgmr.msra.gmra.mxu0 %v3610_v34  ;;  %v198_v33 = vcombine.high %v3629_v24, %v3634_v27 }
  0x76   :  { %1907 = vmatmul.mubr.bf16.vlgmr.msra.gmra.mxu1 %v3612_v35  ;;  %1918 = vmatpush1.bf16.msra.mxu0 %v3088_v36  ;;  %v3150_v36 = vld [vmem:[#allocation6 + $0x5a4] ss:$16 sps:$4 sm:$0xff]  }
  0x77   :  { %1961 = vmatpush1.bf16.msra.mxu1 %v3091_v37  ;;  %1919 = vmatprep.subr.bf16.mxu0 %v3096_v38  ;;  %v3646_v37 = vpack.c.bf16 %v268_v29, %v196_v26  ;;  %v270_v38 = vcombine.high %v3637_v28, %v3642_v30  ;;  %v3225_v26 = vld [vmem:[#allocation6 + $0x26c] ss:$16 sps:$4 sm:$0xff]   ;;  %v3226_v29 = vld [vmem:[#allocation6 + $0x48] ss:$16 sps:$4 sm:$0xff]  }
  0x78   :  { %1962 = vmatprep.subr.bf16.mxu1 %v3099_v39  ;;  %v3153_v39 = vld [vmem:[#allocation6 + $0x7a4] ss:$16 sps:$4 sm:$0xff]  }
  0x79   :  { %1949 = vmatprep.mubr.bf16.mxu0 %v3646_v37  ;;  %v3651_v55 = vpack.c.bf16 %v270_v38, %v198_v33  ;;  %v3232_v33 = vld [vmem:[#allocation6 + $0x28] ss:$16 sps:$4 sm:$0xff]   ;;  %v3240_v38 = vld [vmem:[#allocation6 + $0xc] ss:$16 sps:$4 sm:$0xff]  }
  0x7a   :  { %1920 = vmatpush1.bf16.msra.mxu0 %v3094_v40  ;;  %v3148_v40 = vld [vmem:[#allocation6 + $0x5a0] ss:$16 sps:$4 sm:$0xff]  }
  0x7b   :  { %1963 = vmatpush1.bf16.msra.mxu1 %v3097_v42  ;;  %1921 = vmatprep.subr.bf16.mxu0 %v3102_v43  ;;  %v3151_v42 = vld [vmem:[#allocation6 + $0x7a0] ss:$16 sps:$4 sm:$0xff]   ;;  %v3156_v43 = vld [vmem:[#allocation6 + $0x584] ss:$16 sps:$4 sm:$0xff]  }
  0x7c   :  { %1964 = vmatprep.subr.bf16.mxu1 %v3105_v44  ;;  %v3159_v44 = vld [vmem:[#allocation6 + $0x784] ss:$16 sps:$4 sm:$0xff]   ;;  %1992 = vmatprep.mubr.bf16.mxu1 %v3651_v55 }
  0x7e   :  { %1922 = vmatpush1.bf16.msra.mxu0 %v3100_v45  ;;  %v3154_v45 = vld [vmem:[#allocation6 + $0x580] ss:$16 sps:$4 sm:$0xff]  }
  0x7f   :  { %1965 = vmatpush1.bf16.msra.mxu1 %v3103_v46  ;;  %1923 = vmatprep.subr.bf16.mxu0 %v3108_v47  ;;  %v3157_v46 = vld [vmem:[#allocation6 + $0x780] ss:$16 sps:$4 sm:$0xff]   ;;  %v3162_v47 = vld [vmem:[#allocation6 + $0x564] ss:$16 sps:$4 sm:$0xff]  }
  0x80   :  { %1966 = vmatprep.subr.bf16.mxu1 %v3111_v49  ;;  %v3165_v49 = vld [vmem:[#allocation6 + $0x764] ss:$16 sps:$4 sm:$0xff]  }
  0x82   :  { %1924 = vmatpush1.bf16.msra.mxu0 %v3106_v50  ;;  %v3160_v50 = vld [vmem:[#allocation6 + $0x560] ss:$16 sps:$4 sm:$0xff]  }
  0x83   :  { %1967 = vmatpush1.bf16.msra.mxu1 %v3109_v51  ;;  %1925 = vmatprep.subr.bf16.mxu0 %v3114_v52  ;;  %v3163_v51 = vld [vmem:[#allocation6 + $0x760] ss:$16 sps:$4 sm:$0xff]   ;;  %v3168_v52 = vld [vmem:[#allocation6 + $0x544] ss:$16 sps:$4 sm:$0xff]  }
  0x84   :  { %1968 = vmatprep.subr.bf16.mxu1 %v3117_v53  ;;  %v3171_v53 = vld [vmem:[#allocation6 + $0x744] ss:$16 sps:$4 sm:$0xff]  }
  0x86   :  { %1926 = vmatpush1.bf16.msra.mxu0 %v3112_v54  ;;  %v3166_v54 = vld [vmem:[#allocation6 + $0x540] ss:$16 sps:$4 sm:$0xff]  }
  0x87   :  { %1969 = vmatpush1.bf16.msra.mxu1 %v3115_v56  ;;  %1927 = vmatprep.subr.bf16.mxu0 %v3120_v57  ;;  %v3169_v56 = vld [vmem:[#allocation6 + $0x740] ss:$16 sps:$4 sm:$0xff]   ;;  %v3174_v57 = vld [vmem:[#allocation6 + $0x524] ss:$16 sps:$4 sm:$0xff]  }
  0x88   :  { %1970 = vmatprep.subr.bf16.mxu1 %v3123_v58  ;;  %v3177_v58 = vld [vmem:[#allocation6 + $0x724] ss:$16 sps:$4 sm:$0xff]  }
  0x8a   :  { %1928 = vmatpush1.bf16.msra.mxu0 %v3118_v59  ;;  %v3172_v59 = vld [vmem:[#allocation6 + $0x520] ss:$16 sps:$4 sm:$0xff]  }
  0x8b   :  { %1971 = vmatpush1.bf16.msra.mxu1 %v3121_v60  ;;  %1929 = vmatprep.subr.bf16.mxu0 %v3126_v61  ;;  %v3175_v60 = vld [vmem:[#allocation6 + $0x720] ss:$16 sps:$4 sm:$0xff]   ;;  %v3180_v61 = vld [vmem:[#allocation6 + $0x504] ss:$16 sps:$4 sm:$0xff]  }
  0x8c   :  { %1972 = vmatprep.subr.bf16.mxu1 %v3129_v62  ;;  %v3183_v62 = vld [vmem:[#allocation6 + $0x704] ss:$16 sps:$4 sm:$0xff]  }
  0x8e   :  { %1930 = vmatpush1.bf16.msra.mxu0 %v3124_v63  ;;  %v3178_v63 = vld [vmem:[#allocation6 + $0x500] ss:$16 sps:$4 sm:$0xff]  }
  0x8f   :  { %1973 = vmatpush1.bf16.msra.mxu1 %v3127_v0  ;;  %1931 = vmatprep.subr.bf16.mxu0 %v3132_v1  ;;  %v3181_v0 = vld [vmem:[#allocation6 + $0x700] ss:$16 sps:$4 sm:$0xff]   ;;  %v195_v1 = vcombine.low %v3617_v14, %v3620_v15  ;;  %v3205_v14 = vld [vmem:[#allocation6 + $0x2c8] ss:$16 sps:$4 sm:$0xff]   ;;  %v3210_v15 = vld [vmem:[#allocation6 + $0xac] ss:$16 sps:$4 sm:$0xff]  }
  0x90   :  { %1974 = vmatprep.subr.bf16.mxu1 %v3135_v2  ;;  %v267_v2 = vcombine.low %v3623_v22, %v3626_v23  ;;  %v3219_v22 = vld [vmem:[#allocation6 + $0x28c] ss:$16 sps:$4 sm:$0xff]   ;;  %v3214_v23 = vld [vmem:[#allocation6 + $0x88] ss:$16 sps:$4 sm:$0xff]  }
  0x92   :  { %1932 = vmatpush1.bf16.msra.mxu0 %v3130_v3  ;;  %v197_v3 = vcombine.low %v3629_v24, %v3634_v27  ;;  %v3662_v7 = vpack.c.bf16 %v267_v2, %v195_v1  ;;  %v3217_v24 = vld [vmem:[#allocation6 + $0x288] ss:$16 sps:$4 sm:$0xff]   ;;  %v3276_v1 = vld [vmem:[#allocation6 + $0x14c] ss:$16 sps:$4 sm:$0xff]  }
  0x93   :  { %1975 = vmatpush1.bf16.msra.mxu1 %v3133_v4  ;;  %1933 = vmatprep.subr.bf16.mxu0 %v3138_v5  ;;  %v269_v4 = vcombine.low %v3637_v28, %v3642_v30  ;;  %v3198_v5 = vld [vmem:[#allocation6 + $0xec] ss:$16 sps:$4 sm:$0xff]   ;;  %v3220_v27 = vld [vmem:[#allocation6 + $0x68] ss:$16 sps:$4 sm:$0xff]  }
  0x94   :  { %1976 = vmatprep.subr.bf16.mxu1 %v3141_v6  ;;  %v3201_v6 = vld [vmem:[#allocation6 + $0x2ec] ss:$16 sps:$4 sm:$0xff]   ;;  %v3229_v30 = vld [vmem:[#allocation6 + $0x248] ss:$16 sps:$4 sm:$0xff]  }
  0x95   :  { %v3664_v8 = vpack.c.bf16 %v269_v4, %v197_v3  ;;  %v3231_v28 = vld [vmem:[#allocation6 + $0x24c] ss:$16 sps:$4 sm:$0xff]   ;;  %v3274_v3 = vld [vmem:[#allocation6 + $0x148] ss:$16 sps:$4 sm:$0xff]  }
  0x96   :  { %1934 = vmatpush2.bf16.msra.mxu0 %v3136_v9  ;;  %v3196_v9 = vld [vmem:[#allocation6 + $0xe8] ss:$16 sps:$4 sm:$0xff]   ;;  %v3279_v2 = vld [vmem:[#allocation6 + $0x34c] ss:$16 sps:$4 sm:$0xff]  }
  0x97   :  { %1977 = vmatpush2.bf16.msra.mxu1 %v3139_v10  ;;  %1935 = vmatprep.subr.bf16.mxu0 %v3144_v20  ;;  %v3199_v10 = vld [vmem:[#allocation6 + $0x2e8] ss:$16 sps:$4 sm:$0xff]   ;;  %v3216_v20 = vld [vmem:[#allocation6 + $0x8c] ss:$16 sps:$4 sm:$0xff]  }
  0x98   :  { %1978 = vmatprep.subr.bf16.mxu1 %v3147_v25  ;;  %v3222_v25 = vld [vmem:[#allocation6 + $0x6c] ss:$16 sps:$4 sm:$0xff]   ;;  %v3277_v4 = vld [vmem:[#allocation6 + $0x348] ss:$16 sps:$4 sm:$0xff]  }
  0x9a   :  { %1936 = vmatpush2.bf16.msra.mxu0 %v3142_v31  ;;  %v3234_v31 = vld [vmem:[#allocation6 + $0x2c] ss:$16 sps:$4 sm:$0xff]  }
  0x9b   :  { %1979 = vmatpush2.bf16.msra.mxu1 %v3145_v32  ;;  %1937 = vmatprep.subr.bf16.mxu0 %v3150_v36  ;;  %v3237_v32 = vld [vmem:[#allocation6 + $0x22c] ss:$16 sps:$4 sm:$0xff]   ;;  %v3235_v36 = vld [vmem:[#allocation6 + $0x228] ss:$16 sps:$4 sm:$0xff]  }
  0x9c   :  { %1980 = vmatprep.subr.bf16.mxu1 %v3153_v39  ;;  %v3243_v39 = vld [vmem:[#allocation6 + $0x20c] ss:$16 sps:$4 sm:$0xff]  }
  0x9e   :  { %1938 = vmatpush2.bf16.msra.mxu0 %v3148_v40  ;;  %v3238_v40 = vld [vmem:[#allocation6 + $0x8] ss:$16 sps:$4 sm:$0xff]  }
  0x9f   :  { %1981 = vmatpush2.bf16.msra.mxu1 %v3151_v42  ;;  %1939 = vmatprep.subr.bf16.mxu0 %v3156_v43  ;;  %v3241_v42 = vld [vmem:[#allocation6 + $0x208] ss:$16 sps:$4 sm:$0xff]   ;;  %v3246_v43 = vld [vmem:[#allocation6 + $0x1ec] ss:$16 sps:$4 sm:$0xff]  }
  0xa0   :  { %1982 = vmatprep.subr.bf16.mxu1 %v3159_v44  ;;  %v3249_v44 = vld [vmem:[#allocation6 + $0x3ec] ss:$16 sps:$4 sm:$0xff]  }
  0xa2   :  { %1940 = vmatpush2.bf16.msra.mxu0 %v3154_v45  ;;  %v3244_v45 = vld [vmem:[#allocation6 + $0x1e8] ss:$16 sps:$4 sm:$0xff]  }
  0xa3   :  { %1983 = vmatpush2.bf16.msra.mxu1 %v3157_v46  ;;  %1941 = vmatprep.subr.bf16.mxu0 %v3162_v47  ;;  %v3247_v46 = vld [vmem:[#allocation6 + $0x3e8] ss:$16 sps:$4 sm:$0xff]   ;;  %v3252_v47 = vld [vmem:[#allocation6 + $0x1cc] ss:$16 sps:$4 sm:$0xff]  }
  0xa4   :  { %1984 = vmatprep.subr.bf16.mxu1 %v3165_v49  ;;  %v3255_v49 = vld [vmem:[#allocation6 + $0x3cc] ss:$16 sps:$4 sm:$0xff]  }
  0xa6   :  { %1942 = vmatpush2.bf16.msra.mxu0 %v3160_v50  ;;  %v3250_v50 = vld [vmem:[#allocation6 + $0x1c8] ss:$16 sps:$4 sm:$0xff]  }
  0xa7   :  { %1985 = vmatpush2.bf16.msra.mxu1 %v3163_v51  ;;  %1943 = vmatprep.subr.bf16.mxu0 %v3168_v52  ;;  %v3253_v51 = vld [vmem:[#allocation6 + $0x3c8] ss:$16 sps:$4 sm:$0xff]   ;;  %v3258_v52 = vld [vmem:[#allocation6 + $0x1ac] ss:$16 sps:$4 sm:$0xff]  }
  0xa8   :  { %1986 = vmatprep.subr.bf16.mxu1 %v3171_v53  ;;  %v3261_v53 = vld [vmem:[#allocation6 + $0x3ac] ss:$16 sps:$4 sm:$0xff]  }
  0xaa   :  { %1944 = vmatpush2.bf16.msra.mxu0 %v3166_v54  ;;  %v3256_v54 = vld [vmem:[#allocation6 + $0x1a8] ss:$16 sps:$4 sm:$0xff]  }
  0xab   :  { %1987 = vmatpush2.bf16.msra.mxu1 %v3169_v56  ;;  %1945 = vmatprep.subr.bf16.mxu0 %v3174_v57  ;;  %v3259_v56 = vld [vmem:[#allocation6 + $0x3a8] ss:$16 sps:$4 sm:$0xff]   ;;  %v3264_v57 = vld [vmem:[#allocation6 + $0x18c] ss:$16 sps:$4 sm:$0xff]  }
  0xac   :  { %1988 = vmatprep.subr.bf16.mxu1 %v3177_v58  ;;  %v3267_v58 = vld [vmem:[#allocation6 + $0x38c] ss:$16 sps:$4 sm:$0xff]  }
  0xae   :  { %1946 = vmatpush2.bf16.msra.mxu0 %v3172_v59  ;;  %v3262_v59 = vld [vmem:[#allocation6 + $0x188] ss:$16 sps:$4 sm:$0xff]  }
  0xaf   :  { %1989 = vmatpush2.bf16.msra.mxu1 %v3175_v60  ;;  %1947 = vmatprep.subr.bf16.mxu0 %v3180_v61  ;;  %v3265_v60 = vld [vmem:[#allocation6 + $0x388] ss:$16 sps:$4 sm:$0xff]   ;;  %v3270_v61 = vld [vmem:[#allocation6 + $0x16c] ss:$16 sps:$4 sm:$0xff]  }
  0xb0   :  { %1990 = vmatprep.subr.bf16.mxu1 %v3183_v62  ;;  %v3273_v62 = vld [vmem:[#allocation6 + $0x36c] ss:$16 sps:$4 sm:$0xff]  }
  0xb2   :  { %1948 = vmatpush2.bf16.msra.mxu0 %v3178_v63  ;;  %v3268_v63 = vld [vmem:[#allocation6 + $0x168] ss:$16 sps:$4 sm:$0xff]  }
  0xb3   :  { %1991 = vmatpush2.bf16.msra.mxu1 %v3181_v0  ;;  %2003 = vmatprep.subr.bf16.mxu0 %v3198_v5  ;;  %v3271_v0 = vld [vmem:[#allocation6 + $0x368] ss:$16 sps:$4 sm:$0xff]   ;;  %v3282_v5 = vld [vmem:[#allocation6 + $0x12c] ss:$16 sps:$4 sm:$0xff]  }
  0xb4   :  { %2046 = vmatprep.subr.bf16.mxu1 %v3201_v6  ;;  %v3285_v6 = vld [vmem:[#allocation6 + $0x32c] ss:$16 sps:$4 sm:$0xff]  }
  0xb5   :  { %1950 = vmatmul.mubr.bf16.vlgmr.msra.gmra.mxu0 %v3662_v7 }
  0xb6   :  { %1993 = vmatmul.mubr.bf16.vlgmr.msra.gmra.mxu1 %v3664_v8  ;;  %2004 = vmatpush1.bf16.msra.mxu0 %v3196_v9  ;;  %v3280_v9 = vld [vmem:[#allocation6 + $0x128] ss:$16 sps:$4 sm:$0xff]  }
  0xb7   :  { %2047 = vmatpush1.bf16.msra.mxu1 %v3199_v10  ;;  %2005 = vmatprep.subr.bf16.mxu0 %v3204_v11  ;;  %v3283_v10 = vld [vmem:[#allocation6 + $0x328] ss:$16 sps:$4 sm:$0xff]   ;;  %v3288_v11 = vld [vmem:[#allocation6 + $0x10c] ss:$16 sps:$4 sm:$0xff]  }
  0xb8   :  { %2048 = vmatprep.subr.bf16.mxu1 %v3207_v12  ;;  %2035 = vmatprep.mubr.bf16.mxu0 %v3604_v18  ;;  %v3223_v18 = vld [vmem:[#allocation6 + $0x268] ss:$16 sps:$4 sm:$0xff]   ;;  %v3291_v12 = vld [vmem:[#allocation6 + $0x30c] ss:$16 sps:$4 sm:$0xff]  }
  0xb9   :  { %2078 = vmatprep.mubr.bf16.mxu1 %v3607_v21  ;;  %v3228_v21 = vld [vmem:[#allocation6 + $0x4c] ss:$16 sps:$4 sm:$0xff]  }
  0xba   :  { %2006 = vmatpush1.bf16.msra.mxu0 %v3202_v13  ;;  %v3286_v13 = vld [vmem:[#allocation6 + $0x108] ss:$16 sps:$4 sm:$0xff]  }
  0xbb   :  { %2049 = vmatpush1.bf16.msra.mxu1 %v3205_v14  ;;  %2007 = vmatprep.subr.bf16.mxu0 %v3210_v15  ;;  %v3289_v14 = vld [vmem:[#allocation6 + $0x308] ss:$16 sps:$4 sm:$0xff]   ;;  %v3294_v15 = vld [vmem:[#allocation6 + $0x4ec] ss:$16 sps:$4 sm:$0xff]  }
  0xbc   :  { %2050 = vmatprep.subr.bf16.mxu1 %v3213_v16  ;;  %v3297_v16 = vld [vmem:[#allocation6 + $0x6ec] ss:$16 sps:$4 sm:$0xff]  }
  0xbe   :  { %2008 = vmatpush1.bf16.msra.mxu0 %v3208_v17  ;;  %v3292_v17 = vld [vmem:[#allocation6 + $0x4e8] ss:$16 sps:$4 sm:$0xff]  }
  0xbf   :  { %2051 = vmatpush1.bf16.msra.mxu1 %v3211_v19  ;;  %2009 = vmatprep.subr.bf16.mxu0 %v3216_v20  ;;  %v3295_v19 = vld [vmem:[#allocation6 + $0x6e8] ss:$16 sps:$4 sm:$0xff]   ;;  %v3300_v20 = vld [vmem:[#allocation6 + $0x4cc] ss:$16 sps:$4 sm:$0xff]  }
  0xc0   :  { %2052 = vmatprep.subr.bf16.mxu1 %v3219_v22  ;;  %v3303_v22 = vld [vmem:[#allocation6 + $0x6cc] ss:$16 sps:$4 sm:$0xff]  }
  0xc2   :  { %2010 = vmatpush1.bf16.msra.mxu0 %v3214_v23  ;;  %v3298_v23 = vld [vmem:[#allocation6 + $0x4c8] ss:$16 sps:$4 sm:$0xff]  }
  0xc3   :  { %2053 = vmatpush1.bf16.msra.mxu1 %v3217_v24  ;;  %2011 = vmatprep.subr.bf16.mxu0 %v3222_v25  ;;  %v3301_v24 = vld [vmem:[#allocation6 + $0x6c8] ss:$16 sps:$4 sm:$0xff]   ;;  %v3306_v25 = vld [vmem:[#allocation6 + $0x4ac] ss:$16 sps:$4 sm:$0xff]  }
  0xc4   :  { %2054 = vmatprep.subr.bf16.mxu1 %v3225_v26  ;;  %v3309_v26 = vld [vmem:[#allocation6 + $0x6ac] ss:$16 sps:$4 sm:$0xff]  }
  0xc6   :  { %2012 = vmatpush1.bf16.msra.mxu0 %v3220_v27  ;;  %v3304_v27 = vld [vmem:[#allocation6 + $0x4a8] ss:$16 sps:$4 sm:$0xff]  }
  0xc7   :  { %2055 = vmatpush1.bf16.msra.mxu1 %v3223_v18  ;;  %2013 = vmatprep.subr.bf16.mxu0 %v3228_v21  ;;  %v3307_v18 = vld [vmem:[#allocation6 + $0x6a8] ss:$16 sps:$4 sm:$0xff]   ;;  %v3312_v21 = vld [vmem:[#allocation6 + $0x48c] ss:$16 sps:$4 sm:$0xff]  }
  0xc8   :  { %2056 = vmatprep.subr.bf16.mxu1 %v3231_v28  ;;  %v3315_v28 = vld [vmem:[#allocation6 + $0x68c] ss:$16 sps:$4 sm:$0xff]  }
  0xca   :  { %2014 = vmatpush1.bf16.msra.mxu0 %v3226_v29  ;;  %v3318_v29 = vld [vmem:[#allocation6 + $0x46c] ss:$16 sps:$4 sm:$0xff]  }
  0xcb   :  { %2057 = vmatpush1.bf16.msra.mxu1 %v3229_v30  ;;  %2015 = vmatprep.subr.bf16.mxu0 %v3234_v31  ;;  %v3321_v30 = vld [vmem:[#allocation6 + $0x66c] ss:$16 sps:$4 sm:$0xff]   ;;  %v3316_v31 = vld [vmem:[#allocation6 + $0x468] ss:$16 sps:$4 sm:$0xff]  }
  0xcc   :  { %2058 = vmatprep.subr.bf16.mxu1 %v3237_v32  ;;  %v3327_v32 = vld [vmem:[#allocation6 + $0x64c] ss:$16 sps:$4 sm:$0xff]  }
  0xce   :  { %2016 = vmatpush1.bf16.msra.mxu0 %v3232_v33  ;;  %v3322_v33 = vld [vmem:[#allocation6 + $0x448] ss:$16 sps:$4 sm:$0xff]  }
  0xcf   :  { %2059 = vmatpush1.bf16.msra.mxu1 %v3235_v36  ;;  %2017 = vmatprep.subr.bf16.mxu0 %v3240_v38  ;;  %v3325_v36 = vld [vmem:[#allocation6 + $0x648] ss:$16 sps:$4 sm:$0xff]   ;;  %v3330_v38 = vld [vmem:[#allocation6 + $0x42c] ss:$16 sps:$4 sm:$0xff]  }
  0xd0   :  { %2060 = vmatprep.subr.bf16.mxu1 %v3243_v39  ;;  %v3333_v39 = vld [vmem:[#allocation6 + $0x62c] ss:$16 sps:$4 sm:$0xff]  }
  0xd2   :  { %2018 = vmatpush1.bf16.msra.mxu0 %v3238_v40  ;;  %v3328_v40 = vld [vmem:[#allocation6 + $0x428] ss:$16 sps:$4 sm:$0xff]  }
  0xd3   :  { %2061 = vmatpush1.bf16.msra.mxu1 %v3241_v42  ;;  %2019 = vmatprep.subr.bf16.mxu0 %v3246_v43  ;;  %v3331_v42 = vld [vmem:[#allocation6 + $0x628] ss:$16 sps:$4 sm:$0xff]   ;;  %v3336_v43 = vld [vmem:[#allocation6 + $0x40c] ss:$16 sps:$4 sm:$0xff]  }
  0xd4   :  { %2062 = vmatprep.subr.bf16.mxu1 %v3249_v44  ;;  %v3339_v44 = vld [vmem:[#allocation6 + $0x60c] ss:$16 sps:$4 sm:$0xff]  }
  0xd6   :  { %2020 = vmatpush2.bf16.msra.mxu0 %v3244_v45  ;;  %v3334_v45 = vld [vmem:[#allocation6 + $0x408] ss:$16 sps:$4 sm:$0xff]  }
  0xd7   :  { %2063 = vmatpush2.bf16.msra.mxu1 %v3247_v46  ;;  %2021 = vmatprep.subr.bf16.mxu0 %v3252_v47  ;;  %v3337_v46 = vld [vmem:[#allocation6 + $0x608] ss:$16 sps:$4 sm:$0xff]   ;;  %v3342_v47 = vld [vmem:[#allocation6 + $0x5ec] ss:$16 sps:$4 sm:$0xff]  }
  0xd8   :  { %2064 = vmatprep.subr.bf16.mxu1 %v3255_v49  ;;  %v3345_v49 = vld [vmem:[#allocation6 + $0x7ec] ss:$16 sps:$4 sm:$0xff]  }
  0xda   :  { %2022 = vmatpush2.bf16.msra.mxu0 %v3250_v50  ;;  %v3340_v50 = vld [vmem:[#allocation6 + $0x5e8] ss:$16 sps:$4 sm:$0xff]  }
  0xdb   :  { %2065 = vmatpush2.bf16.msra.mxu1 %v3253_v51  ;;  %2023 = vmatprep.subr.bf16.mxu0 %v3258_v52  ;;  %v3343_v51 = vld [vmem:[#allocation6 + $0x7e8] ss:$16 sps:$4 sm:$0xff]   ;;  %v3348_v52 = vld [vmem:[#allocation6 + $0x5cc] ss:$16 sps:$4 sm:$0xff]  }
  0xdc   :  { %2066 = vmatprep.subr.bf16.mxu1 %v3261_v53  ;;  %v3351_v53 = vld [vmem:[#allocation6 + $0x7cc] ss:$16 sps:$4 sm:$0xff]  }
  0xde   :  { %2024 = vmatpush2.bf16.msra.mxu0 %v3256_v54  ;;  %v3346_v54 = vld [vmem:[#allocation6 + $0x5c8] ss:$16 sps:$4 sm:$0xff]  }
  0xdf   :  { %2067 = vmatpush2.bf16.msra.mxu1 %v3259_v56  ;;  %2025 = vmatprep.subr.bf16.mxu0 %v3264_v57  ;;  %v3349_v56 = vld [vmem:[#allocation6 + $0x7c8] ss:$16 sps:$4 sm:$0xff]   ;;  %v3354_v57 = vld [vmem:[#allocation6 + $0x5ac] ss:$16 sps:$4 sm:$0xff]  }
  0xe0   :  { %2068 = vmatprep.subr.bf16.mxu1 %v3267_v58  ;;  %v3357_v58 = vld [vmem:[#allocation6 + $0x7ac] ss:$16 sps:$4 sm:$0xff]  }
  0xe2   :  { %2026 = vmatpush2.bf16.msra.mxu0 %v3262_v59  ;;  %v3352_v59 = vld [vmem:[#allocation6 + $0x5a8] ss:$16 sps:$4 sm:$0xff]  }
  0xe3   :  { %2069 = vmatpush2.bf16.msra.mxu1 %v3265_v60  ;;  %2027 = vmatprep.subr.bf16.mxu0 %v3270_v61  ;;  %v3355_v60 = vld [vmem:[#allocation6 + $0x7a8] ss:$16 sps:$4 sm:$0xff]   ;;  %v3360_v61 = vld [vmem:[#allocation6 + $0x58c] ss:$16 sps:$4 sm:$0xff]  }
  0xe4   :  { %2070 = vmatprep.subr.bf16.mxu1 %v3273_v62  ;;  %v3363_v62 = vld [vmem:[#allocation6 + $0x78c] ss:$16 sps:$4 sm:$0xff]  }
  0xe6   :  { %2028 = vmatpush2.bf16.msra.mxu0 %v3268_v63  ;;  %v3358_v63 = vld [vmem:[#allocation6 + $0x588] ss:$16 sps:$4 sm:$0xff]  }
  0xe7   :  { %2071 = vmatpush2.bf16.msra.mxu1 %v3271_v0  ;;  %2029 = vmatprep.subr.bf16.mxu0 %v3276_v1  ;;  %v3361_v0 = vld [vmem:[#allocation6 + $0x788] ss:$16 sps:$4 sm:$0xff]   ;;  %v3366_v1 = vld [vmem:[#allocation6 + $0x56c] ss:$16 sps:$4 sm:$0xff]  }
  0xe8   :  { %2072 = vmatprep.subr.bf16.mxu1 %v3279_v2  ;;  %v3369_v2 = vld [vmem:[#allocation6 + $0x76c] ss:$16 sps:$4 sm:$0xff]  }
  0xea   :  { %2030 = vmatpush2.bf16.msra.mxu0 %v3274_v3  ;;  %v3364_v3 = vld [vmem:[#allocation6 + $0x568] ss:$16 sps:$4 sm:$0xff]  }
  0xeb   :  { %2073 = vmatpush2.bf16.msra.mxu1 %v3277_v4  ;;  %2031 = vmatprep.subr.bf16.mxu0 %v3282_v5  ;;  %v3367_v4 = vld [vmem:[#allocation6 + $0x768] ss:$16 sps:$4 sm:$0xff]   ;;  %v3372_v5 = vld [vmem:[#allocation6 + $0x54c] ss:$16 sps:$4 sm:$0xff]  }
  0xec   :  { %2074 = vmatprep.subr.bf16.mxu1 %v3285_v6  ;;  %v3375_v6 = vld [vmem:[#allocation6 + $0x74c] ss:$16 sps:$4 sm:$0xff]  }
  0xee   :  { %2032 = vmatpush2.bf16.msra.mxu0 %v3280_v9  ;;  %v3370_v9 = vld [vmem:[#allocation6 + $0x548] ss:$16 sps:$4 sm:$0xff]  }
  0xef   :  { %2075 = vmatpush2.bf16.msra.mxu1 %v3283_v10  ;;  %2033 = vmatprep.subr.bf16.mxu0 %v3288_v11  ;;  %v3373_v10 = vld [vmem:[#allocation6 + $0x748] ss:$16 sps:$4 sm:$0xff]   ;;  %v3378_v11 = vld [vmem:[#allocation6 + $0x52c] ss:$16 sps:$4 sm:$0xff]  }
  0xf0   :  { %2076 = vmatprep.subr.bf16.mxu1 %v3291_v12  ;;  %v3381_v12 = vld [vmem:[#allocation6 + $0x72c] ss:$16 sps:$4 sm:$0xff]  }
  0xf2   :  { %2034 = vmatpush2.bf16.msra.mxu0 %v3286_v13  ;;  %v3376_v13 = vld [vmem:[#allocation6 + $0x528] ss:$16 sps:$4 sm:$0xff]  }
  0xf3   :  { %2077 = vmatpush2.bf16.msra.mxu1 %v3289_v14  ;;  %2089 = vmatprep.subr.bf16.mxu0 %v3294_v15  ;;  %v3379_v14 = vld [vmem:[#allocation6 + $0x728] ss:$16 sps:$4 sm:$0xff]   ;;  %v3384_v15 = vld [vmem:[#allocation6 + $0x50c] ss:$16 sps:$4 sm:$0xff]  }
  0xf4   :  { %2132 = vmatprep.subr.bf16.mxu1 %v3297_v16  ;;  %v3387_v16 = vld [vmem:[#allocation6 + $0x70c] ss:$16 sps:$4 sm:$0xff]  }
  0xf5   :  { %2036 = vmatmul.mubr.bf16.vlgmr.msra.gmra.mxu0 %v3610_v34  ;;  %v3310_v34 = vld [vmem:[#allocation6 + $0x488] ss:$16 sps:$4 sm:$0xff]  }
  0xf6   :  { %2079 = vmatmul.mubr.bf16.vlgmr.msra.gmra.mxu1 %v3612_v35  ;;  %2090 = vmatpush1.bf16.msra.mxu0 %v3292_v17  ;;  %v3313_v35 = vld [vmem:[#allocation6 + $0x688] ss:$16 sps:$4 sm:$0xff]  }
  0xf7   :  { %2133 = vmatpush1.bf16.msra.mxu1 %v3295_v19  ;;  %2091 = vmatprep.subr.bf16.mxu0 %v3300_v20  ;;  %v3382_v17 = vld [vmem:[#allocation6 + $0x508] ss:$16 sps:$4 sm:$0xff]   ;;  %v3388_v20 = vld [vmem:[#allocation9 + $0x78] sm:$0xff]  }
  0xf8   :  { %2134 = vmatprep.subr.bf16.mxu1 %v3303_v22  ;;  %2121 = vmatprep.mubr.bf16.mxu0 %v3646_v37  ;;  %v3319_v37 = vld [vmem:[#allocation6 + $0x668] ss:$16 sps:$4 sm:$0xff]   ;;  %v3389_v22 = vld [vmem:[#allocation9 + $0x38] sm:$0xff]  }
  0xf9   :  { %2164 = vmatprep.mubr.bf16.mxu1 %v3651_v55  ;;  %v3324_v55 = vld [vmem:[#allocation6 + $0x44c] ss:$16 sps:$4 sm:$0xff]   ;;  %v3385_v19 = vld [vmem:[#allocation6 + $0x708] ss:$16 sps:$4 sm:$0xff]  }
  0xfa   :  { %2092 = vmatpush1.bf16.msra.mxu0 %v3298_v23  ;;  %v3390_v23 = vld [vmem:[#allocation9 + $0x70] sm:$0xff]  }
  0xfb   :  { %2135 = vmatpush1.bf16.msra.mxu1 %v3301_v24  ;;  %2093 = vmatprep.subr.bf16.mxu0 %v3306_v25  ;;  %v3391_v24 = vld [vmem:[#allocation9 + $0x30] sm:$0xff]   ;;  %v3392_v25 = vld [vmem:[#allocation9 + $0x68] sm:$0xff]  }
  0xfc   :  { %2136 = vmatprep.subr.bf16.mxu1 %v3309_v26  ;;  %v3393_v26 = vld [vmem:[#allocation9 + $0x28] sm:$0xff]  }
  0xfe   :  { %2094 = vmatpush1.bf16.msra.mxu0 %v3304_v27  ;;  %v3394_v27 = vld [vmem:[#allocation9 + $0x60] sm:$0xff]  }
  0xff   :  { %2137 = vmatpush1.bf16.msra.mxu1 %v3307_v18  ;;  %2095 = vmatprep.subr.bf16.mxu0 %v3312_v21  ;;  %v3404_v18 = vld [vmem:[#allocation9 + $0xf8] sm:$0xff]  }
 0x100   :  { %2138 = vmatprep.subr.bf16.mxu1 %v3315_v28  ;;  %v3405_v21 = vld [vmem:[#allocation9 + $0xb8] sm:$0xff]   ;;  %v3406_v28 = vld [vmem:[#allocation9 + $0xf0] sm:$0xff]  }
 0x102   :  { %2096 = vmatpush1.bf16.msra.mxu0 %v3310_v34  ;;  %v3395_v34 = vld [vmem:[#allocation9 + $0x20] sm:$0xff]  }
 0x103   :  { %2139 = vmatpush1.bf16.msra.mxu1 %v3313_v35  ;;  %2097 = vmatprep.subr.bf16.mxu0 %v3318_v29  ;;  %v3396_v35 = vld [vmem:[#allocation9 + $0x58] sm:$0xff]  }
 0x104   :  { %2140 = vmatprep.subr.bf16.mxu1 %v3321_v30  ;;  %v3397_v29 = vld [vmem:[#allocation9 + $0x18] sm:$0xff]   ;;  %v3398_v30 = vld [vmem:[#allocation9 + $0x50] sm:$0xff]  }
 0x106   :  { %2098 = vmatpush1.bf16.msra.mxu0 %v3316_v31  ;;  %v3409_v31 = vld [vmem:[#allocation9 + $0xa8] sm:$0xff]  }
 0x107   :  { %2141 = vmatpush1.bf16.msra.mxu1 %v3319_v37  ;;  %2099 = vmatprep.subr.bf16.mxu0 %v3324_v55  ;;  %v3410_v37 = vld [vmem:[#allocation9 + $0xe0] sm:$0xff]   ;;  %v3399_v55 = vld [vmem:[#allocation9 + $0x10] sm:$0xff]  }
 0x108   :  { %2142 = vmatprep.subr.bf16.mxu1 %v3327_v32  ;;  %v3400_v32 = vld [vmem:[#allocation9 + $0x48] sm:$0xff]  }
 0x10a   :  { %2100 = vmatpush1.bf16.msra.mxu0 %v3322_v33  ;;  %v3411_v33 = vld [vmem:[#allocation9 + $0xa0] sm:$0xff]  }
 0x10b   :  { %2143 = vmatpush1.bf16.msra.mxu1 %v3325_v36  ;;  %2101 = vmatprep.subr.bf16.mxu0 %v3330_v38  ;;  %v3401_v36 = vld [vmem:[#allocation9 + $0x8] sm:$0xff]   ;;  %v3402_v38 = vld [vmem:[#allocation9 + $0x40] sm:$0xff]  }
 0x10c   :  { %2144 = vmatprep.subr.bf16.mxu1 %v3333_v39  ;;  %v3403_v39 = vld [vmem:[#allocation9] sm:$0xff]  }
 0x10e   :  { %2102 = vmatpush1.bf16.msra.mxu0 %v3328_v40 }
 0x10f   :  { %2145 = vmatpush1.bf16.msra.mxu1 %v3331_v42  ;;  %2103 = vmatprep.subr.bf16.mxu0 %v3336_v43 }
 0x110   :  { %2146 = vmatprep.subr.bf16.mxu1 %v3339_v44 }
 0x112   :  { %2104 = vmatpush1.bf16.msra.mxu0 %v3334_v45 }
 0x113   :  { %2147 = vmatpush1.bf16.msra.mxu1 %v3337_v46  ;;  %2105 = vmatprep.subr.bf16.mxu0 %v3342_v47 }
 0x114   :  { %2148 = vmatprep.subr.bf16.mxu1 %v3345_v49 }
 0x116   :  { %2106 = vmatpush2.bf16.msra.mxu0 %v3340_v50 }
 0x117   :  { %2149 = vmatpush2.bf16.msra.mxu1 %v3343_v51  ;;  %2107 = vmatprep.subr.bf16.mxu0 %v3348_v52 }
 0x118   :  { %2150 = vmatprep.subr.bf16.mxu1 %v3351_v53  ;;  %v3412_v53 = vld [vmem:[#allocation9 + $0xd8] sm:$0xff]  }
 0x11a   :  { %2108 = vmatpush2.bf16.msra.mxu0 %v3346_v54 }
 0x11b   :  { %2151 = vmatpush2.bf16.msra.mxu1 %v3349_v56  ;;  %2109 = vmatprep.subr.bf16.mxu0 %v3354_v57  ;;  %v2210_v56 = vsub.s32 1, %v3591_v48  ;;  %v3413_v57 = vld [vmem:[#allocation9 + $0x98] sm:$0xff]  }
 0x11c   :  { %2152 = vmatprep.subr.bf16.mxu1 %v3357_v58 }
 0x11e   :  { %2110 = vmatpush2.bf16.msra.mxu0 %v3352_v59  ;;  %v2206_v59 = vsub.s32 0, %v3591_v48 }
 0x11f   :  { %2153 = vmatpush2.bf16.msra.mxu1 %v3355_v60  ;;  %2111 = vmatprep.subr.bf16.mxu0 %v3360_v61 }
 0x120   :  { %2154 = vmatprep.subr.bf16.mxu1 %v3363_v62 }
 0x122   :  { %2112 = vmatpush2.bf16.msra.mxu0 %v3358_v63  ;;  %v3678_v63 = vld [vmem:[#allocation8] sm:$0xf] }
 0x123   :  { %2155 = vmatpush2.bf16.msra.mxu1 %v3361_v0  ;;  %2113 = vmatprep.subr.bf16.mxu0 %v3366_v1 }
 0x124   :  { %2156 = vmatprep.subr.bf16.mxu1 %v3369_v2 }
 0x126   :  { %2114 = vmatpush2.bf16.msra.mxu0 %v3364_v3  ;;  %v3414_v3 = vld [vmem:[#allocation9 + $0xd0] sm:$0xff]  }
 0x127   :  { %2157 = vmatpush2.bf16.msra.mxu1 %v3367_v4  ;;  %2115 = vmatprep.subr.bf16.mxu0 %v3372_v5 }
 0x128   :  { %2158 = vmatprep.subr.bf16.mxu1 %v3375_v6  ;;  %v2211_v6 = vrot.slane %v3678_v63, %v2210_v56 }
 0x12a   :  { %2116 = vmatpush2.bf16.msra.mxu0 %v3370_v9 }
 0x12b   :  { %2159 = vmatpush2.bf16.msra.mxu1 %v3373_v10  ;;  %2117 = vmatprep.subr.bf16.mxu0 %v3378_v11  ;;  %v3415_v10 = vld [vmem:[#allocation9 + $0x90] sm:$0xff]  }
 0x12c   :  { %2160 = vmatprep.subr.bf16.mxu1 %v3381_v12  ;;  %v2207_v12 = vrot.slane %v3678_v63, %v2206_v59 }
 0x12e   :  { %2118 = vmatpush2.bf16.msra.mxu0 %v3376_v13 }
 0x12f   :  { %2161 = vmatpush2.bf16.msra.mxu1 %v3379_v14  ;;  %2119 = vmatprep.subr.bf16.mxu0 %v3384_v15 }
 0x130   :  { %2162 = vmatprep.subr.bf16.mxu1 %v3387_v16 }
 0x132   :  { %2120 = vmatpush2.bf16.msra.mxu0 %v3382_v17  ;;  %v3416_v17 = vld [vmem:[#allocation9 + $0xc8] sm:$0xff]  }
 0x133   :  { %2163 = vmatpush2.bf16.msra.mxu1 %v3385_v19  ;;  %2924 = vmatprep.subr.bf16.mxu0 %v3388_v20 }
 0x134   :  { %2946 = vmatprep.subr.bf16.mxu1 %v3404_v18 }
 0x135   :  { %2122 = vmatmul.mubr.bf16.vlgmr.msra.gmra.mxu0 %v3662_v7  ;;  %v3407_v7 = vld [vmem:[#allocation9 + $0xb0] sm:$0xff]   ;;  %v1865_v40 = vpop.f32.mrf.mxu0 }
 0x136   :  { %2165 = vmatmul.mubr.bf16.vlgmr.msra.gmra.mxu1 %v3664_v8  ;;  %2925 = vmatpush3.bf16.msra.mxu0 %v3389_v22  ;;  %v3408_v8 = vld [vmem:[#allocation9 + $0xe8] sm:$0xff]   ;;  %v1908_v42 = vpop.f32.mrf.mxu1 }
 0x137   :  { %2926 = vmatprep.subr.bf16.mxu0 %v3390_v23  ;;  %2947 = vmatpush3.bf16.msra.mxu1 %v3405_v21  ;;  %v1867_v43 = vpop.f32.mrf.mxu0  ;;  %v1909_v50 = vadd.f32 %v1908_v42, %v1865_v40  ;;  %v3417_v23 = vld [vmem:[#allocation9 + $0x88] sm:$0xff]   ;;  %v2218_v42 = vsub.s32 3, %v3591_v48 }
 0x138   :  { %2948 = vmatprep.subr.bf16.mxu1 %v3406_v28  ;;  %v1910_v44 = vpop.f32.mrf.mxu1  ;;  %v3419_v28 = vld [vmem:[#allocation9 + $0x80] sm:$0xff]  }
 0x139   :  { %v1869_v45 = vpop.f32.mrf.mxu0  ;;  %v1911_v54 = vadd.f32 %v1910_v44, %v1867_v43  ;;  %v2214_v44 = vsub.s32 2, %v3591_v48 }
 0x13a   :  { %2927 = vmatpush3.bf16.msra.mxu0 %v3391_v24  ;;  %v1912_v46 = vpop.f32.mrf.mxu1 }
 0x13b   :  { %2928 = vmatprep.subr.bf16.mxu0 %v3392_v25  ;;  %2949 = vmatpush3.bf16.msra.mxu1 %v3407_v7  ;;  %v1871_v47 = vpop.f32.mrf.mxu0  ;;  %v1913_v62 = vadd.f32 %v1912_v46, %v1869_v45 }
 0x13c   :  { %2950 = vmatprep.subr.bf16.mxu1 %v3408_v8  ;;  %v1914_v49 = vpop.f32.mrf.mxu1 }
 0x13d   :  { %v1915_v4 = vadd.f32 %v1914_v49, %v1871_v47 }
 0x13e   :  { %2929 = vmatpush3.bf16.msra.mxu0 %v3393_v26 }
 0x13f   :  { %2930 = vmatprep.subr.bf16.mxu0 %v3394_v27  ;;  %2951 = vmatpush3.bf16.msra.mxu1 %v3409_v31  ;;  %v3418_v27 = vld [vmem:[#allocation9 + $0xc0] sm:$0xff]  }
 0x140   :  { %2952 = vmatprep.subr.bf16.mxu1 %v3410_v37 }
 0x142   :  { %2931 = vmatpush3.bf16.msra.mxu0 %v3395_v34 }
 0x143   :  { %2932 = vmatprep.subr.bf16.mxu0 %v3396_v35  ;;  %2953 = vmatpush3.bf16.msra.mxu1 %v3411_v33 }
 0x144   :  { %2954 = vmatprep.subr.bf16.mxu1 %v3412_v53 }
 0x146   :  { %2933 = vmatpush3.bf16.msra.mxu0 %v3397_v29 }
 0x147   :  { %2934 = vmatprep.subr.bf16.mxu0 %v3398_v30  ;;  %2955 = vmatpush3.bf16.msra.mxu1 %v3413_v57 }
 0x148   :  { %2956 = vmatprep.subr.bf16.mxu1 %v3414_v3 }
 0x14a   :  { %2935 = vmatpush3.bf16.msra.mxu0 %v3399_v55 }
 0x14b   :  { %2936 = vmatprep.subr.bf16.mxu0 %v3400_v32  ;;  %2957 = vmatpush3.bf16.msra.mxu1 %v3415_v10 }
 0x14c   :  { %2958 = vmatprep.subr.bf16.mxu1 %v3416_v17 }
 0x14e   :  { %2937 = vmatpush3.bf16.msra.mxu0 %v3401_v36 }
 0x14f   :  { %2938 = vmatprep.subr.bf16.mxu0 %v3402_v38  ;;  %2959 = vmatpush3.bf16.msra.mxu1 %v3417_v23 }
 0x150   :  { %2960 = vmatprep.subr.bf16.mxu1 %v3418_v27 }
 0x152   :  { %2939 = vmatpush3.bf16.msra.mxu0 %v3403_v39 }
 0x153   :  { %2961 = vmatpush3.bf16.msra.mxu1 %v3419_v28 }
 0x175   :  { %v1951_v51 = vpop.f32.mrf.mxu0 }
 0x176   :  { %v1994_v52 = vpop.f32.mrf.mxu1  ;;  %v1952_v58 = vadd.f32 %v1951_v51, %v1909_v50 }
 0x177   :  { %v1953_v60 = vpop.f32.mrf.mxu0 }
 0x178   :  { %v1996_v61 = vpop.f32.mrf.mxu1  ;;  %v1954_v0 = vadd.f32 %v1953_v60, %v1911_v54  ;;  %v1995_v11 = vadd.f32 %v1994_v52, %v1952_v58  ;;  %v2219_v54 = vrot.slane %v3678_v63, %v2218_v42  ;;  %v2215_v58 = vrot.slane %v3678_v63, %v2214_v44 }
 0x179   :  { %v1955_v1 = vpop.f32.mrf.mxu0 }
 0x17a   :  { %v1998_v2 = vpop.f32.mrf.mxu1  ;;  %v1997_v5 = vadd.f32 %v1996_v61, %v1954_v0  ;;  %v1956_v9 = vadd.f32 %v1955_v1, %v1913_v62  ;;  %v2224_v24 = vadd.f32 %v2207_v12, %v1995_v11 }
 0x17b   :  { %v1957_v13 = vpop.f32.mrf.mxu0 }
 0x17c   :  { %v1999_v14 = vadd.f32 %v1998_v2, %v1956_v9  ;;  %v1958_v15 = vadd.f32 %v1957_v13, %v1915_v4  ;;  %v2000_v16 = vpop.f32.mrf.mxu1  ;;  %v2225_v19 = vadd.f32 %v2211_v6, %v1997_v5  ;;  %v2232_v34 = vmax.f32 %v2224_v24, 0.0 }
 0x17e   :  { %v2228_v20 = vadd.f32 %v2207_v12, %v1999_v14  ;;  %v2001_v22 = vadd.f32 %v2000_v16, %v1958_v15  ;;  %v2233_v18 = vmax.f32 %v2225_v19, 0.0  ;;  %v2891_v15 = vld [vmem:[%s3697_s4] ss:$0 sm:$0xff]  ;;  %v2590_v19 = vand.u32 127, %v134_v41 }
 0x180   :  { %v2229_v25 = vadd.f32 %v2211_v6, %v2001_v22  ;;  %v2236_v26 = vmax.f32 %v2228_v20, 0.0  ;;  %vm2591_vm0 = vcmp.lt.s32.totalorder %v2590_v19, 11 }
 0x182   :  { %v2237_v21 = vmax.f32 %v2229_v25, 0.0  ;;  %v2240_v7 = vpack.c.bf16 %v2236_v26, %v2232_v34 }
 0x184   :  { %v2241_v35 = vpack.c.bf16 %v2237_v21, %v2233_v18 }
 0x186   :  { %2539 = vmatprep.mubr.bf16.mxu0 %v2241_v35 }
 0x187   :  { %2540 = vmatmul.mubr.bf16.vlgmr.msra.gmra.mxu0 %v2240_v7 }
 0x1b5   :  { %v2037_v8 = vpop.f32.mrf.mxu0 }
 0x1b6   :  { %v2080_v29 = vpop.f32.mrf.mxu1 }
 0x1b7   :  { %v2039_v30 = vpop.f32.mrf.mxu0  ;;  %v2081_v36 = vadd.f32 %v2080_v29, %v2037_v8 }
 0x1b8   :  { %v2082_v31 = vpop.f32.mrf.mxu1 }
 0x1b9   :  { %v2041_v37 = vpop.f32.mrf.mxu0  ;;  %v2083_v40 = vadd.f32 %v2082_v31, %v2039_v30 }
 0x1ba   :  { %v2084_v55 = vpop.f32.mrf.mxu1 }
 0x1bb   :  { %v2043_v32 = vpop.f32.mrf.mxu0  ;;  %v2085_v47 = vadd.f32 %v2084_v55, %v2041_v37 }
 0x1bc   :  { %v2086_v33 = vpop.f32.mrf.mxu1 }
 0x1bd   :  { %v2087_v52 = vadd.f32 %v2086_v33, %v2043_v32 }
 0x1f5   :  { %v2123_v38 = vpop.f32.mrf.mxu0 }
 0x1f6   :  { %v2166_v39 = vpop.f32.mrf.mxu1  ;;  %v2124_v43 = vadd.f32 %v2123_v38, %v2081_v36 }
 0x1f7   :  { %v2125_v45 = vpop.f32.mrf.mxu0 }
 0x1f8   :  { %v2168_v46 = vpop.f32.mrf.mxu1  ;;  %v2126_v49 = vadd.f32 %v2125_v45, %v2083_v40  ;;  %v2167_v57 = vadd.f32 %v2166_v39, %v2124_v43 }
 0x1f9   :  { %v2127_v50 = vpop.f32.mrf.mxu0 }
 0x1fa   :  { %v2170_v51 = vpop.f32.mrf.mxu1  ;;  %v2169_v53 = vadd.f32 %v2168_v46, %v2126_v49  ;;  %v2128_v56 = vadd.f32 %v2127_v50, %v2085_v47  ;;  %v2226_v2 = vadd.f32 %v2215_v58, %v2167_v57 }
 0x1fb   :  { %v2129_v59 = vpop.f32.mrf.mxu0 }
 0x1fc   :  { %v2171_v60 = vadd.f32 %v2170_v51, %v2128_v56  ;;  %v2130_v61 = vadd.f32 %v2129_v59, %v2087_v52  ;;  %v2172_v62 = vpop.f32.mrf.mxu1  ;;  %v2227_v0 = vadd.f32 %v2219_v54, %v2169_v53  ;;  %v2234_v9 = vmax.f32 %v2226_v2, 0.0 }
 0x1fe   :  { %v2230_v48 = vadd.f32 %v2215_v58, %v2171_v60  ;;  %v2173_v1 = vadd.f32 %v2172_v62, %v2130_v61  ;;  %v2235_v5 = vmax.f32 %v2227_v0, 0.0 }
 0x200   :  { %v2231_v3 = vadd.f32 %v2219_v54, %v2173_v1  ;;  %v2238_v4 = vmax.f32 %v2230_v48, 0.0 }
 0x202   :  { %v2239_v6 = vmax.f32 %v2231_v3, 0.0  ;;  %v2242_v11 = vpack.c.bf16 %v2238_v4, %v2234_v9 }
 0x204   :  { %v2243_v10 = vpack.c.bf16 %v2239_v6, %v2235_v5 }
 0x206   :  { %2580 = vmatprep.mubr.bf16.mxu1 %v2243_v10 }
 0x207   :  { %2581 = vmatmul.mubr.bf16.vlgmr.msra.gmra.mxu1 %v2242_v11 }
 0x247   :  { %v2940_v12 = vpop.f32.mrf.mxu0 }
 0x249   :  { %v2941_v13 = vpop.f32.mrf.mxu0 }
 0x24a   :  { %v2942_v14 = vadd.f32 %v2941_v13, %v2940_v12 }
 0x24b   :  { %v2943_v63 = vpop.f32.mrf.mxu0 }
 0x24c   :  { %v2542_v22 = vadd.f32 %v2942_v14, %v2891_v15 }
 0x24d   :  { %v2944_v16 = vpop.f32.mrf.mxu0 }
 0x24e   :  { %v2945_v23 = vadd.f32 %v2944_v16, %v2943_v63 }
 0x250   :  { %v2545_v18 = vadd.f32 %v2945_v23, %v2891_v15 }
 0x2c7   :  { %v2962_v17 = vpop.f32.mrf.mxu1 }
 0x2c9   :  { %v2963_v20 = vpop.f32.mrf.mxu1 }
 0x2ca   :  { %v2964_v24 = vadd.f32 %v2963_v20, %v2962_v17 }
 0x2cb   :  { %v2965_v25 = vpop.f32.mrf.mxu1 }
 0x2cc   :  { %v2583_v26 = vadd.f32 %v2964_v24, %v2542_v22 }
 0x2cd   :  { %v2966_v27 = vpop.f32.mrf.mxu1 }
 0x2ce   :  { %v2967_v21 = vadd.f32 %v2966_v27, %v2965_v25  ;;  %v2592_v28 = vsel %vm2591_vm0, %v2583_v26, -1e+30 }
 0x2cf   :  { %2594 = vmax.xlane.f32.xlu0 %v2592_v28 }
 0x2d0   :  { %v2586_v34 = vadd.f32 %v2967_v21, %v2545_v18 }
 0x2d2   :  { %v2593_v35 = vsel %vm2591_vm0, %v2586_v34, -1e+30 }
 0x2d3   :  { %2596 = vmax.xlane.f32.xlu0 %v2593_v35 }
 0x358   :  { %v2595_v7 = vpop.xlane.xlu0 %2594 }
 0x359   :  { %v2598_v8 = vsub.f32 %v2592_v28, %v2595_v7 }
 0x35b   :  { %v2600_v29 = vmul.f32 1.442695, %v2598_v8 }
 0x35c   :  { %v2597_v30 = vpop.xlane.xlu0 %2596 }
 0x35d   :  { %v2599_v41 = vsub.f32 %v2593_v35, %v2597_v30  ;;  %3420 = vpow2.f32 %v2600_v29 }
 0x35f   :  { %v2602_v31 = vmul.f32 1.442695, %v2599_v41 }
 0x361   :  { %3422 = vpow2.f32 %v2602_v31 }
 0x36a   :  { %v3421_v37 = vpop.eup %3420 }
 0x36b   :  { %2604 = vadd.xlane.f32.xlu1 %v3421_v37 }
 0x36e   :  { %v3423_v55 = vpop.eup %3422 }
 0x36f   :  { %2606 = vadd.xlane.f32.xlu1 %v3423_v55 }
 0x3f4   :  { %v2605_v32 = vpop.xlane.xlu1 %2604 }
 0x3f5   :  { %3424 = vlog2.f32 %v2605_v32 }
 0x3f8   :  { %v2607_v33 = vpop.xlane.xlu1 %2606 }
 0x3f9   :  { %3426 = vlog2.f32 %v2607_v33 }
 0x402   :  { %v3425_v36 = vpop.eup %3424 }
 0x403   :  { %v2609_v38 = vmul.f32 0.6931472, %v3425_v36 }
 0x405   :  { %v2612_v39 = vsub.f32 %v2598_v8, %v2609_v38 }
 0x406   :  { %v3427_v40 = vpop.eup %3426 }
 0x407   :  { %2614 = vst [vmem:[#allocation11] sm:$0xff] %v2612_v39  ;;  %v2611_v42 = vmul.f32 0.6931472, %v3427_v40 }
 0x409   :  { %v2613_v43 = vsub.f32 %v2599_v41, %v2611_v42 }
 0x40b   :  { %2615 = vst [vmem:[#allocation11 + $0x8] sm:$0xff] %v2613_v43 }
 0x40c   :  { %2620 = vsyncadd [#allocation5], 224  ;;  %s3545_s4 = smov [#allocation11]  }
 0x40d   :  { %s2621_s16 = sshll.u32 %s3545_s4, 4  ;;  %s2622_s16 = int_to_ptr.vmem [resolvable:$true] %s2621_s16 }
 0x40e   :  { %s3508_s17 = scalar_lea.vmem %s2622_s16, 32  ;;  %s3512_s18 = scalar_lea.vmem %s2622_s16, 256 }
 0x40f   :  { %p3509_p6 = scmp.ne.s32.totalorder %s2622_s16, %s3508_s17  ;;  %p3513_p7 = scmp.lt.s32.totalorder %s2622_s16, %s2622_s16 }
 0x410   :  { %p3514_p8 = scmp.lt.s32.totalorder %s3512_s18, %s3508_s17 }
 0x412   :  { %p3515_p9 = por %p3514_p8, %p3513_p7 }
 0x414   :  { %p3516_p10 = pnand %p3515_p9, %p3509_p6 }
 0x416   :  { %3519 = shalt.err (!%p3516_p10)
}
 0x417   :  { %s3546_s19 = smov 32   ;;  %s3547_s20 = smov 2  }
 0x418   :  { %2627 = dma.vmem_to_hbm [thread:$0]  %s2622_s16, 32, %s3698_s5, [#allocation5], %s3546_s19, %s3546_s19, %s3547_s20  }
 0x419   :  { %3534 = dma.done.wait [#allocation5], 256  }
 0x41a   :  { %3535 = vsyncadd [#allocation5], 4294967040 }
 0x41b   :  { %2631 = vsyncpa [#allocation4], 1 }
 0x41c   :  { %2632 = vsyncpa [#allocation7], 1 }
 0x41d   :  { %2633 = vsyncpa [#allocation10], 1 }
 0x41e   :  { %2634 = vsyncpa [#allocation5], 1 }

</bundles_post_ra>
